<compile_context>
chip_gen: v6e
topology: v6e:2x2x1
jax: 0.10.0
libtpu: 0.0.40
codegen_flags: <defaults>
</compile_context>

<pallas_src>
import functools

import jax
import jax.numpy as jnp
from jax.experimental import pallas as pl
from jax.experimental.pallas import tpu as pltpu


LANE = 128  # TPU vreg lane width; assign output is padded to this for lane-dense stores


def graph_cluster_kernel(adj_ref, x_ref, w1_ref, b1_ref, w2_ref, b2_ref,
                         wbase_ref, wassign_ref, out_ref, *, num_layers):
    g, n, in_dim = x_ref.shape
    hidden = w2_ref.shape[1]
    z_pad = wassign_ref.shape[1]

    # --- MLP encoder on the row-stacked graphs (M = g*n fills the MXU tile) ---
    x = x_ref[...].reshape(g * n, in_dim)
    h = jnp.tanh(
        jnp.dot(x, w1_ref[...], preferred_element_type=jnp.float32) + b1_ref[...])
    h = jnp.tanh(
        jnp.dot(h, w2_ref[...], preferred_element_type=jnp.float32) + b2_ref[...])

    # adjacency is only needed from here on (keeps vregs free during fc1/fc2)
    adj = adj_ref[...]                                   # (g, n, n)

    # --- base_net: num_layers x GraphConvSparse(hidden, hidden), act=tanh ---
    for l in range(num_layers):                          # static unroll (small)
        hw = jnp.dot(h, wbase_ref[l], preferred_element_type=jnp.float32)
        hw = hw.reshape(g, n, hidden)
        h = jnp.tanh(jnp.einsum('gnm,gmd->gnd', adj, hw,
                                preferred_element_type=jnp.float32))
        h = h.reshape(g * n, hidden)

    # --- assign_net: GraphConvSparse(hidden, z_dim padded to 128), act=tanh ---
    hw = jnp.dot(h, wassign_ref[...], preferred_element_type=jnp.float32)
    hw = hw.reshape(g, n, z_pad)
    out_ref[...] = jnp.tanh(
        jnp.einsum('gnm,gmd->gnd', adj, hw,
                   preferred_element_type=jnp.float32)).astype(out_ref.dtype)


def graph_cluster_forward(adj, x, w1, b1, w2, b2, w_base, w_assign, *,
                          num_layers, graphs_per_step=4):
    """Batched GraphCluster forward: adj [B,N,N], x [B,N,in] -> [B,N,z_dim]."""
    b, n, _ = adj.shape
    in_dim = x.shape[-1]
    hidden = w2.shape[1]
    z_dim = w_assign.shape[1]
    assert w_base.shape[0] == num_layers

    # graphs processed per grid step (rows stacked to fill the MXU tile)
    g = min(graphs_per_step, b)
    while b % g:
        g -= 1
    grid = (b // g,)

    # Zero-pad assign weight to a full 128-lane output so final stores are
    # unmasked / lane-dense; the extra columns are tanh(0)=0 and sliced off.
    z_pad = ((z_dim + LANE - 1) // LANE) * LANE
    w_assign_p = jnp.zeros((hidden, z_pad), jnp.float32).at[:, :z_dim].set(w_assign)

    out = pl.pallas_call(
        functools.partial(graph_cluster_kernel, num_layers=num_layers),
        out_shape=jax.ShapeDtypeStruct((b, n, z_pad), jnp.float32),
        grid=grid,
        in_specs=[
            pl.BlockSpec((g, n, n), lambda i: (i, 0, 0)),                    # adj
            pl.BlockSpec((g, n, in_dim), lambda i: (i, 0, 0)),               # x
            pl.BlockSpec((in_dim, 128), lambda i: (0, 0)),                   # w1
            pl.BlockSpec((1, 128), lambda i: (0, 0)),                        # b1
            pl.BlockSpec((128, hidden), lambda i: (0, 0)),                   # w2
            pl.BlockSpec((1, hidden), lambda i: (0, 0)),                     # b2
            pl.BlockSpec((num_layers, hidden, hidden), lambda i: (0, 0, 0)), # w_base
            pl.BlockSpec((hidden, z_pad), lambda i: (0, 0)),                 # w_assign
        ],
        out_specs=pl.BlockSpec((g, n, z_pad), lambda i: (i, 0, 0)),
        compiler_params=pltpu.CompilerParams(
            dimension_semantics=("parallel",)),   # shards the graph batch over TCs (v7x)
    )(adj, x, w1, b1, w2, b2, w_base, w_assign_p)

    return out[:, :, :z_dim]


# jit the whole wrapper so weight padding / output slicing fuse around the
# pallas_call instead of running as separate eager XLA dispatches.
graph_cluster_forward_jit = jax.jit(
    graph_cluster_forward, static_argnames=("num_layers", "graphs_per_step"))


def glorot_init(key, in_dim, out_dim):
    # matches glorot_init in the reference: U(-r, r), r = sqrt(6/(in+out))
    r = jnp.sqrt(6.0 / (in_dim + out_dim))
    return jax.random.uniform(key, (in_dim, out_dim), jnp.float32, -r, r)


def linear_init(key, in_dim, out_dim):
    # deterministic stand-in for torch Linear default init: U(-1/sqrt(in), 1/sqrt(in))
    kw, kb = jax.random.split(key)
    bound = 1.0 / jnp.sqrt(jnp.float32(in_dim))
    w = jax.random.uniform(kw, (in_dim, out_dim), jnp.float32, -bound, bound)
    b = jax.random.uniform(kb, (1, out_dim), jnp.float32, -bound, bound)
    return w, b


def reference_forward(adj, x, w1, b1, w2, b2, w_base, w_assign):
    # per-graph pure-JAX reference matching the PyTorch module, vmapped over graphs
    def single(a, xi):
        h = jnp.tanh(xi @ w1 + b1)
        h = jnp.tanh(h @ w2 + b2)
        for l in range(w_base.shape[0]):
            h = jnp.tanh(a @ (h @ w_base[l]))
        return jnp.tanh(a @ (h @ w_assign))
    return jax.vmap(single)(adj, x)


if __name__ == "__main__":
    # small shapes consistent with the module (batch of independent graphs)
    B = 8             # graphs batched into one pallas_call (grid axis)
    N = 64            # nodes per graph
    INPUT_DIM = 16
    HIDDEN_DIM = 32
    Z_DIM = 32
    NUM_LAYERS = 3

    key = jax.random.PRNGKey(0)
    k_adj, k_x, k_fc1, k_fc2, k_base, k_assign = jax.random.split(key, 6)

    # symmetric 0/1 adjacency with self loops (typical dense graph input)
    a = (jax.random.uniform(k_adj, (B, N, N)) < 0.2).astype(jnp.float32)
    eye = jnp.eye(N, dtype=jnp.float32)[None]
    adj = jnp.clip(a + jnp.swapaxes(a, -1, -2) + eye, 0.0, 1.0)
    x = jax.random.normal(k_x, (B, N, INPUT_DIM), jnp.float32)

    # parameters (deterministic, in-script)
    w1, b1 = linear_init(k_fc1, INPUT_DIM, 128)          # fc1
    w2, b2 = linear_init(k_fc2, 128, HIDDEN_DIM)         # fc2
    base_keys = jax.random.split(k_base, NUM_LAYERS)
    w_base = jnp.stack([glorot_init(bk, HIDDEN_DIM, HIDDEN_DIM) for bk in base_keys])
    w_assign = glorot_init(k_assign, HIDDEN_DIM, Z_DIM)  # assign_net

    out = graph_cluster_forward_jit(adj, x, w1, b1, w2, b2, w_base, w_assign,
                                    num_layers=NUM_LAYERS, graphs_per_step=4)
    out = jax.block_until_ready(out)

    ref = reference_forward(adj, x, w1, b1, w2, b2, w_base, w_assign)
    assert out.shape == (B, N, Z_DIM)
    assert jnp.max(jnp.abs(out - ref)) < 1e-5

    print("KERNEL_OK")
</pallas_src>

<mosaic_0001>
module attributes {stable_mosaic.version = 11 : i64} {
  func.func @graph_cluster_kernel(%arg0: i32, %arg1: memref<4x64x64xf32, #tpu.memory_space<vmem>>, %arg2: memref<4x64x16xf32, #tpu.memory_space<vmem>>, %arg3: memref<16x128xf32, #tpu.memory_space<vmem>>, %arg4: memref<1x128xf32, #tpu.memory_space<vmem>>, %arg5: memref<128x32xf32, #tpu.memory_space<vmem>>, %arg6: memref<1x32xf32, #tpu.memory_space<vmem>>, %arg7: memref<3x32x32xf32, #tpu.memory_space<vmem>>, %arg8: memref<32x128xf32, #tpu.memory_space<vmem>>, %arg9: memref<4x64x128xf32, #tpu.memory_space<vmem>>) attributes {dimension_semantics = [#tpu.dimension_semantics<parallel>], iteration_bounds = array<i64: 2>, scalar_prefetch = 0 : i64, scratch_operands = 0 : i64, tpu.core_type = #tpu.core_type<tc>, window_params = [{transform_indices = @transform_0, window_bounds = array<i64: 4, 64, 64>}, {transform_indices = @transform_1, window_bounds = array<i64: 4, 64, 16>}, {pipeline_mode = #tpu.pipeline_mode<synchronous>, transform_indices = @transform_2, window_bounds = array<i64: 16, 128>}, {pipeline_mode = #tpu.pipeline_mode<synchronous>, transform_indices = @transform_3, window_bounds = array<i64: 1, 128>}, {pipeline_mode = #tpu.pipeline_mode<synchronous>, transform_indices = @transform_4, window_bounds = array<i64: 128, 32>}, {pipeline_mode = #tpu.pipeline_mode<synchronous>, transform_indices = @transform_5, window_bounds = array<i64: 1, 32>}, {pipeline_mode = #tpu.pipeline_mode<synchronous>, transform_indices = @transform_6, window_bounds = array<i64: 3, 32, 32>}, {pipeline_mode = #tpu.pipeline_mode<synchronous>, transform_indices = @transform_7, window_bounds = array<i64: 32, 128>}, {transform_indices = @transform_8, window_bounds = array<i64: 4, 64, 128>}]} {
    %c0 = arith.constant 0 : index
    %c0_0 = arith.constant 0 : index
    %c0_1 = arith.constant 0 : index
    %0 = vector.load %arg2[%c0, %c0_0, %c0_1] : memref<4x64x16xf32, #tpu.memory_space<vmem>>, vector<4x64x16xf32>
    %1 = vector.shape_cast %0 : vector<4x64x16xf32> to vector<256x16xf32>
    %c0_2 = arith.constant 0 : index
    %c0_3 = arith.constant 0 : index
    %2 = vector.load %arg3[%c0_2, %c0_3] : memref<16x128xf32, #tpu.memory_space<vmem>>, vector<16x128xf32>
    %cst = arith.constant dense<0.000000e+00> : vector<256x128xf32>
    %3 = tpu.matmul %1, %2, %cst {dimension_numbers = #tpu.dot_dimension_numbers<[1], [0], [0], [1], [0, 0, 1, 1], [], []>} : vector<256x16xf32>, vector<16x128xf32>, vector<256x128xf32> -> vector<256x128xf32>
    %c0_4 = arith.constant 0 : index
    %c0_5 = arith.constant 0 : index
    %4 = vector.load %arg4[%c0_4, %c0_5] : memref<1x128xf32, #tpu.memory_space<vmem>>, vector<1x128xf32>
    %5 = vector.broadcast %4 : vector<1x128xf32> to vector<256x128xf32>
    %6 = arith.addf %3, %5 : vector<256x128xf32>
    %7 = math.tanh %6 : vector<256x128xf32>
    %c0_6 = arith.constant 0 : index
    %c0_7 = arith.constant 0 : index
    %8 = vector.load %arg5[%c0_6, %c0_7] : memref<128x32xf32, #tpu.memory_space<vmem>>, vector<128x32xf32>
    %cst_8 = arith.constant dense<0.000000e+00> : vector<256x32xf32>
    %9 = tpu.matmul %7, %8, %cst_8 {dimension_numbers = #tpu.dot_dimension_numbers<[1], [0], [0], [1], [0, 0, 1, 1], [], []>} : vector<256x128xf32>, vector<128x32xf32>, vector<256x32xf32> -> vector<256x32xf32>
    %c0_9 = arith.constant 0 : index
    %c0_10 = arith.constant 0 : index
    %10 = vector.load %arg6[%c0_9, %c0_10] : memref<1x32xf32, #tpu.memory_space<vmem>>, vector<1x32xf32>
    %11 = vector.broadcast %10 : vector<1x32xf32> to vector<256x32xf32>
    %12 = arith.addf %9, %11 : vector<256x32xf32>
    %13 = math.tanh %12 : vector<256x32xf32>
    %c0_11 = arith.constant 0 : index
    %c0_12 = arith.constant 0 : index
    %c0_13 = arith.constant 0 : index
    %14 = vector.load %arg1[%c0_11, %c0_12, %c0_13] : memref<4x64x64xf32, #tpu.memory_space<vmem>>, vector<4x64x64xf32>
    %c0_14 = arith.constant 0 : index
    %c0_15 = arith.constant 0 : index
    %c0_16 = arith.constant 0 : index
    %15 = vector.load %arg7[%c0_14, %c0_15, %c0_16] : memref<3x32x32xf32, #tpu.memory_space<vmem>>, vector<1x32x32xf32>
    %16 = vector.shape_cast %15 : vector<1x32x32xf32> to vector<32x32xf32>
    %cst_17 = arith.constant dense<0.000000e+00> : vector<256x32xf32>
    %17 = tpu.matmul %13, %16, %cst_17 {dimension_numbers = #tpu.dot_dimension_numbers<[1], [0], [0], [1], [0, 0, 1, 1], [], []>} : vector<256x32xf32>, vector<32x32xf32>, vector<256x32xf32> -> vector<256x32xf32>
    %18 = vector.shape_cast %17 : vector<256x32xf32> to vector<4x64x32xf32>
    "tpu.trace_start"() <{level = 10 : i32, message = "gnm,gmd->gnd"}> : () -> ()
    %cst_18 = arith.constant dense<0.000000e+00> : vector<4x64x32xf32>
    %19 = tpu.matmul %14, %18, %cst_18 {dimension_numbers = #tpu.dot_dimension_numbers<[2], [1], [1], [2], [0, 0, 0, 1, 1, 2], [0], [0]>} : vector<4x64x64xf32>, vector<4x64x32xf32>, vector<4x64x32xf32> -> vector<4x64x32xf32>
    "tpu.trace_stop"() : () -> ()
    %20 = math.tanh %19 : vector<4x64x32xf32>
    %21 = vector.shape_cast %20 : vector<4x64x32xf32> to vector<256x32xf32>
    %c1 = arith.constant 1 : index
    %c0_19 = arith.constant 0 : index
    %c0_20 = arith.constant 0 : index
    %22 = vector.load %arg7[%c1, %c0_19, %c0_20] : memref<3x32x32xf32, #tpu.memory_space<vmem>>, vector<1x32x32xf32>
    %23 = vector.shape_cast %22 : vector<1x32x32xf32> to vector<32x32xf32>
    %cst_21 = arith.constant dense<0.000000e+00> : vector<256x32xf32>
    %24 = tpu.matmul %21, %23, %cst_21 {dimension_numbers = #tpu.dot_dimension_numbers<[1], [0], [0], [1], [0, 0, 1, 1], [], []>} : vector<256x32xf32>, vector<32x32xf32>, vector<256x32xf32> -> vector<256x32xf32>
    %25 = vector.shape_cast %24 : vector<256x32xf32> to vector<4x64x32xf32>
    "tpu.trace_start"() <{level = 10 : i32, message = "gnm,gmd->gnd"}> : () -> ()
    %cst_22 = arith.constant dense<0.000000e+00> : vector<4x64x32xf32>
    %26 = tpu.matmul %14, %25, %cst_22 {dimension_numbers = #tpu.dot_dimension_numbers<[2], [1], [1], [2], [0, 0, 0, 1, 1, 2], [0], [0]>} : vector<4x64x64xf32>, vector<4x64x32xf32>, vector<4x64x32xf32> -> vector<4x64x32xf32>
    "tpu.trace_stop"() : () -> ()
    %27 = math.tanh %26 : vector<4x64x32xf32>
    %28 = vector.shape_cast %27 : vector<4x64x32xf32> to vector<256x32xf32>
    %c2 = arith.constant 2 : index
    %c0_23 = arith.constant 0 : index
    %c0_24 = arith.constant 0 : index
    %29 = vector.load %arg7[%c2, %c0_23, %c0_24] : memref<3x32x32xf32, #tpu.memory_space<vmem>>, vector<1x32x32xf32>
    %30 = vector.shape_cast %29 : vector<1x32x32xf32> to vector<32x32xf32>
    %cst_25 = arith.constant dense<0.000000e+00> : vector<256x32xf32>
    %31 = tpu.matmul %28, %30, %cst_25 {dimension_numbers = #tpu.dot_dimension_numbers<[1], [0], [0], [1], [0, 0, 1, 1], [], []>} : vector<256x32xf32>, vector<32x32xf32>, vector<256x32xf32> -> vector<256x32xf32>
    %32 = vector.shape_cast %31 : vector<256x32xf32> to vector<4x64x32xf32>
    "tpu.trace_start"() <{level = 10 : i32, message = "gnm,gmd->gnd"}> : () -> ()
    %cst_26 = arith.constant dense<0.000000e+00> : vector<4x64x32xf32>
    %33 = tpu.matmul %14, %32, %cst_26 {dimension_numbers = #tpu.dot_dimension_numbers<[2], [1], [1], [2], [0, 0, 0, 1, 1, 2], [0], [0]>} : vector<4x64x64xf32>, vector<4x64x32xf32>, vector<4x64x32xf32> -> vector<4x64x32xf32>
    "tpu.trace_stop"() : () -> ()
    %34 = math.tanh %33 : vector<4x64x32xf32>
    %35 = vector.shape_cast %34 : vector<4x64x32xf32> to vector<256x32xf32>
    %c0_27 = arith.constant 0 : index
    %c0_28 = arith.constant 0 : index
    %36 = vector.load %arg8[%c0_27, %c0_28] : memref<32x128xf32, #tpu.memory_space<vmem>>, vector<32x128xf32>
    %cst_29 = arith.constant dense<0.000000e+00> : vector<256x128xf32>
    %37 = tpu.matmul %35, %36, %cst_29 {dimension_numbers = #tpu.dot_dimension_numbers<[1], [0], [0], [1], [0, 0, 1, 1], [], []>} : vector<256x32xf32>, vector<32x128xf32>, vector<256x128xf32> -> vector<256x128xf32>
    %38 = vector.shape_cast %37 : vector<256x128xf32> to vector<4x64x128xf32>
    "tpu.trace_start"() <{level = 10 : i32, message = "gnm,gmd->gnd"}> : () -> ()
    %cst_30 = arith.constant dense<0.000000e+00> : vector<4x64x128xf32>
    %39 = tpu.matmul %14, %38, %cst_30 {dimension_numbers = #tpu.dot_dimension_numbers<[2], [1], [1], [2], [0, 0, 0, 1, 1, 2], [0], [0]>} : vector<4x64x64xf32>, vector<4x64x128xf32>, vector<4x64x128xf32> -> vector<4x64x128xf32>
    "tpu.trace_stop"() : () -> ()
    %40 = math.tanh %39 : vector<4x64x128xf32>
    %c0_31 = arith.constant 0 : index
    %c0_32 = arith.constant 0 : index
    %c0_33 = arith.constant 0 : index
    %41 = vector.load %arg9[%c0_31, %c0_32, %c0_33] : memref<4x64x128xf32, #tpu.memory_space<vmem>>, vector<4x64x128xf32>
    tpu.vector_store %arg9[%c0_31, %c0_32, %c0_33], %40 {strides = array<i32>} : memref<4x64x128xf32, #tpu.memory_space<vmem>>, vector<4x64x128xf32>,
    return
  }
  func.func @transform_0(%arg0: i32) -> (i32, i32, i32) {
    %c0_i32 = arith.constant 0 : i32
    %c0_i32_0 = arith.constant 0 : i32
    %c0_i32_1 = arith.constant 0 : i32
    return %arg0, %c0_i32, %c0_i32_0 : i32, i32, i32
  }
  func.func @transform_1(%arg0: i32) -> (i32, i32, i32) {
    %c0_i32 = arith.constant 0 : i32
    %c0_i32_0 = arith.constant 0 : i32
    %c0_i32_1 = arith.constant 0 : i32
    return %arg0, %c0_i32, %c0_i32_0 : i32, i32, i32
  }
  func.func @transform_2(%arg0: i32) -> (i32, i32) {
    %c0_i32 = arith.constant 0 : i32
    %c0_i32_0 = arith.constant 0 : i32
    %c0_i32_1 = arith.constant 0 : i32
    return %c0_i32, %c0_i32_0 : i32, i32
  }
  func.func @transform_3(%arg0: i32) -> (i32, i32) {
    %c0_i32 = arith.constant 0 : i32
    %c0_i32_0 = arith.constant 0 : i32
    %c0_i32_1 = arith.constant 0 : i32
    return %c0_i32, %c0_i32_0 : i32, i32
  }
  func.func @transform_4(%arg0: i32) -> (i32, i32) {
    %c0_i32 = arith.constant 0 : i32
    %c0_i32_0 = arith.constant 0 : i32
    %c0_i32_1 = arith.constant 0 : i32
    return %c0_i32, %c0_i32_0 : i32, i32
  }
  func.func @transform_5(%arg0: i32) -> (i32, i32) {
    %c0_i32 = arith.constant 0 : i32
    %c0_i32_0 = arith.constant 0 : i32
    %c0_i32_1 = arith.constant 0 : i32
    return %c0_i32, %c0_i32_0 : i32, i32
  }
  func.func @transform_6(%arg0: i32) -> (i32, i32, i32) {
    %c0_i32 = arith.constant 0 : i32
    %c0_i32_0 = arith.constant 0 : i32
    %c0_i32_1 = arith.constant 0 : i32
    %c0_i32_2 = arith.constant 0 : i32
    return %c0_i32, %c0_i32_0, %c0_i32_1 : i32, i32, i32
  }
  func.func @transform_7(%arg0: i32) -> (i32, i32) {
    %c0_i32 = arith.constant 0 : i32
    %c0_i32_0 = arith.constant 0 : i32
    %c0_i32_1 = arith.constant 0 : i32
    return %c0_i32, %c0_i32_0 : i32, i32
  }
  func.func @transform_8(%arg0: i32) -> (i32, i32, i32) {
    %c0_i32 = arith.constant 0 : i32
    %c0_i32_0 = arith.constant 0 : i32
    %c0_i32_1 = arith.constant 0 : i32
    return %arg0, %c0_i32, %c0_i32_0 : i32, i32, i32
  }
}

</mosaic_0001>

<bundles_post_ra>
// kernel: graph_cluster_forward.1
= control target key start
LH: loop header
LB: loop body
LE: loop exit
PB: predicated region body
PF: predicated region fallthrough
CT: control target
= control target key end

     0   :  { %s6436_s27 = smov 0   ;;  %s7328_s0 = inlined_call_operand.vmem [shape: f32[8,64,64], index: 0, kind: input, shape index: {}]   ;;  %s7329_s1 = inlined_call_operand.vmem [shape: f32[8,64,16], index: 1, kind: input, shape index: {}]   ;;  %s7330_s2 = inlined_call_operand.vmem [shape: f32[16,128], index: 2, kind: input, shape index: {}]   ;;  %s7331_s3 = inlined_call_operand.vmem [shape: f32[1,128], index: 3, kind: input, shape index: {}]   ;;  %s7332_s4 = inlined_call_operand.vmem [shape: f32[128,32], index: 4, kind: input, shape index: {}]   ;;  %s7333_s5 = inlined_call_operand.vmem [shape: f32[1,32], index: 5, kind: input, shape index: {}]   ;;  %s7334_s6 = inlined_call_operand.vmem [shape: f32[3,32,32], index: 6, kind: input, shape index: {}]   ;;  %s7335_s7 = inlined_call_operand.vmem [shape: f32[32,128], index: 7, kind: input, shape index: {}]   ;;  %s7336_s8 = inlined_call_operand.vmem [shape: f32[8,64,128], index: 8, kind: output, shape index: {}]  }
   0x1 LB: > { %s4356_s28 = sadd.s32 4294967295, %s6389_s27   ;;  %p4360_p0 = scmp.ge.s32.totalorder %s6389_s27, 1  ;;  %s6389_s27 = sphi %s6436_s27, %s18_s27  }
   0x2   : > { %p276_p1 = scmp.lt.s32.totalorder %s6389_s27, 3 }
   0x4   : > { %p277_p2 = pnand %p4360_p0, %p276_p1 }
   0x5   : > { %s4361_s11 = sshll.u32 (!%p277_p2), %s4356_s28, 2 }
   0x6   : > { %280 = sbr.rel (%p277_p2) target bundleno = 2225 (0x8b1), region = 52  ;;  %p319_p3 = scmp.lt.s32.totalorder (!%p277_p2), %s4361_s11, 7 }
   0xb   : > { %v372_v0 = vld [vmem:[%s7330_s2 + $0x8] sm:$0xff]  ;;  %v371_v1 = vld [vmem:[%s7330_s2] sm:$0xff]  ;;  %v749_v2 = vld [vmem:[%s7332_s4 + $0x78] sm:$0xff]  ;;  %s7338_s11 = smov (!%p319_p3, %s4361_s11), 7  ;;  %vm380_vm0 = vcmask 130048   ;;  %vm1050_vm1 = vcmask 261120  }
   0xc   : > { %5155 = vmatprep.subr.mxu0 %v372_v0  ;;  %5207 = vmatprep.subr.mxu1 %v749_v2  ;;  %v748_v3 = vld [vmem:[%s7332_s4 + $0x70] sm:$0xff]  ;;  %v747_v4 = vld [vmem:[%s7332_s4 + $0x68] sm:$0xff]  ;;  %v746_v5 = vld [vmem:[%s7332_s4 + $0x60] sm:$0xff]  ;;  %s6462_s20 = sshll.u32 %s7338_s11, 6  ;;  %vm1372_vm2 = vcmask 523264  }
   0xd   : > { %5156 = vmatpush3.msra.mxu0 %v372_v0  ;;  %5208 = vmatpush3.msra.mxu1 %v749_v2  ;;  %s6468_s23 = scalar_lea.vmem %s7329_s1, %s6462_s20  ;;  %v745_v6 = vld [vmem:[%s7332_s4 + $0x58] sm:$0xff]  ;;  %v744_v10 = vld [vmem:[%s7332_s4 + $0x50] sm:$0xff]  ;;  %v743_v40 = vld [vmem:[%s7332_s4 + $0x48] sm:$0xff]  ;;  %s6692_s22 = scalar_lea.vmem %s7328_s0, %s6462_s20 }
   0xe   : > { %5157 = vmatprep.subr.mxu0 %v371_v1  ;;  %5209 = vmatprep.subr.mxu1 %v748_v3  ;;  %v339_v7 = vld [vmem:[%s6468_s23] sm:$0xff]  ;;  %v340_v8 = vld [vmem:[%s6468_s23 + $0x8] sm:$0xff]  ;;  %v341_v9 = vld [vmem:[%s6468_s23 + $0x10] sm:$0xff]  ;;  %s7291_s30 = scalar_lea.vmem %s7336_s8, %s6462_s20 }
   0xf   : > { %5158 = vmatpush3.msra.mxu0 %v371_v1  ;;  %5210 = vmatpush3.msra.mxu1 %v748_v3  ;;  %v342_v11 = vld [vmem:[%s6468_s23 + $0x18] sm:$0xff]  ;;  %v343_v12 = vld [vmem:[%s6468_s23 + $0x20] sm:$0xff]  ;;  %v344_v13 = vld [vmem:[%s6468_s23 + $0x28] sm:$0xff] }
  0x10   : > { %5211 = vmatprep.subr.mxu1 %v747_v4  ;;  %5159 = vmatprep.mubr.msk.f32.mxu0 %vm380_vm0, %v339_v7  ;;  %v345_v14 = vld [vmem:[%s6468_s23 + $0x30] sm:$0xff]  ;;  %v346_v15 = vld [vmem:[%s6468_s23 + $0x38] sm:$0xff]  ;;  %v347_v16 = vld [vmem:[%s6468_s23 + $0x40] sm:$0xff] }
  0x11   : > { %5212 = vmatpush3.msra.mxu1 %v747_v4  ;;  %5160 = vmatmul.mubr.msk.f32.vlgmr.msra.gmra.mxu0 %vm380_vm0, %v340_v8  ;;  %v348_v17 = vld [vmem:[%s6468_s23 + $0x48] sm:$0xff]  ;;  %v349_v18 = vld [vmem:[%s6468_s23 + $0x50] sm:$0xff]  ;;  %v350_v19 = vld [vmem:[%s6468_s23 + $0x58] sm:$0xff] }
  0x12   : > { %5213 = vmatprep.subr.mxu1 %v746_v5  ;;  %5162 = vmatprep.mubr.msk.f32.mxu0 %vm380_vm0, %v341_v9  ;;  %v351_v20 = vld [vmem:[%s6468_s23 + $0x60] sm:$0xff]  ;;  %v352_v21 = vld [vmem:[%s6468_s23 + $0x68] sm:$0xff]  ;;  %v353_v22 = vld [vmem:[%s6468_s23 + $0x70] sm:$0xff] }
  0x13   : > { %5214 = vmatpush3.msra.mxu1 %v746_v5  ;;  %v354_v23 = vld [vmem:[%s6468_s23 + $0x78] sm:$0xff]  ;;  %v355_v24 = vld [vmem:[%s6468_s23 + $0x80] sm:$0xff]  ;;  %v356_v25 = vld [vmem:[%s6468_s23 + $0x88] sm:$0xff] }
  0x14   : > { %5215 = vmatprep.subr.mxu1 %v745_v6  ;;  %v357_v26 = vld [vmem:[%s6468_s23 + $0x90] sm:$0xff]  ;;  %v358_v27 = vld [vmem:[%s6468_s23 + $0x98] sm:$0xff]  ;;  %v359_v28 = vld [vmem:[%s6468_s23 + $0xa0] sm:$0xff] }
  0x15   : > { %5216 = vmatpush3.msra.mxu1 %v745_v6  ;;  %5163 = vmatmul.mubr.msk.f32.gmra.mxu0 %vm380_vm0, %v342_v11  ;;  %v360_v29 = vld [vmem:[%s6468_s23 + $0xa8] sm:$0xff]  ;;  %v361_v30 = vld [vmem:[%s6468_s23 + $0xb0] sm:$0xff]  ;;  %v362_v31 = vld [vmem:[%s6468_s23 + $0xb8] sm:$0xff] }
  0x16   : > { %5217 = vmatprep.subr.mxu1 %v744_v10  ;;  %5165 = vmatprep.mubr.msk.f32.mxu0 %vm380_vm0, %v343_v12  ;;  %v363_v32 = vld [vmem:[%s6468_s23 + $0xc0] sm:$0xff]  ;;  %v364_v33 = vld [vmem:[%s6468_s23 + $0xc8] sm:$0xff]  ;;  %v365_v34 = vld [vmem:[%s6468_s23 + $0xd0] sm:$0xff] }
  0x17   : > { %5218 = vmatpush3.msra.mxu1 %v744_v10  ;;  %v366_v35 = vld [vmem:[%s6468_s23 + $0xd8] sm:$0xff]  ;;  %v367_v36 = vld [vmem:[%s6468_s23 + $0xe0] sm:$0xff]  ;;  %v368_v37 = vld [vmem:[%s6468_s23 + $0xe8] sm:$0xff] }
  0x18   : > { %v369_v38 = vld [vmem:[%s6468_s23 + $0xf0] sm:$0xff]  ;;  %v370_v39 = vld [vmem:[%s6468_s23 + $0xf8] sm:$0xff]  ;;  %5219 = vmatprep.subr.mxu1 %v743_v40  ;;  %v742_v41 = vld [vmem:[%s7332_s4 + $0x40] sm:$0xff] }
  0x19   : > { %5166 = vmatmul.mubr.msk.f32.gmra.mxu0 %vm380_vm0, %v344_v13  ;;  %5220 = vmatpush3.msra.mxu1 %v743_v40  ;;  %v741_v42 = vld [vmem:[%s7332_s4 + $0x38] sm:$0xff]  ;;  %v740_v43 = vld [vmem:[%s7332_s4 + $0x30] sm:$0xff]  ;;  %v739_v44 = vld [vmem:[%s7332_s4 + $0x28] sm:$0xff] }
  0x1a   : > { %5168 = vmatprep.mubr.msk.f32.mxu0 %vm380_vm0, %v345_v14  ;;  %5221 = vmatprep.subr.mxu1 %v742_v41  ;;  %v738_v45 = vld [vmem:[%s7332_s4 + $0x20] sm:$0xff]  ;;  %v737_v46 = vld [vmem:[%s7332_s4 + $0x18] sm:$0xff]  ;;  %v736_v47 = vld [vmem:[%s7332_s4 + $0x10] sm:$0xff] }
  0x1b   : > { %5222 = vmatpush3.msra.mxu1 %v742_v41  ;;  %v735_v48 = vld [vmem:[%s7332_s4 + $0x8] sm:$0xff]  ;;  %v734_v49 = vld [vmem:[%s7332_s4] sm:$0xff] }
  0x1c   : > { %5223 = vmatprep.subr.mxu1 %v741_v42  ;;  %v6573_v50 = vld [vmem:[%s7331_s3] ss:$0 sm:$0xff] }
  0x1d   : > { %5169 = vmatmul.mubr.msk.f32.gmra.mxu0 %vm380_vm0, %v346_v15  ;;  %5224 = vmatpush3.msra.mxu1 %v741_v42 }
  0x1e   : > { %5171 = vmatprep.mubr.msk.f32.mxu0 %vm380_vm0, %v347_v16  ;;  %5225 = vmatprep.subr.mxu1 %v740_v43 }
  0x1f   : > { %5226 = vmatpush3.msra.mxu1 %v740_v43 }
  0x20   : > { %5227 = vmatprep.subr.mxu1 %v739_v44 }
  0x21   : > { %5172 = vmatmul.mubr.msk.f32.gmra.mxu0 %vm380_vm0, %v348_v17  ;;  %5228 = vmatpush3.msra.mxu1 %v739_v44 }
  0x22   : > { %5174 = vmatprep.mubr.msk.f32.mxu0 %vm380_vm0, %v349_v18  ;;  %5229 = vmatprep.subr.mxu1 %v738_v45 }
  0x23   : > { %5230 = vmatpush3.msra.mxu1 %v738_v45 }
  0x24   : > { %5231 = vmatprep.subr.mxu1 %v737_v46 }
  0x25   : > { %5175 = vmatmul.mubr.msk.f32.gmra.mxu0 %vm380_vm0, %v350_v19  ;;  %5232 = vmatpush3.msra.mxu1 %v737_v46 }
  0x26   : > { %5177 = vmatprep.mubr.msk.f32.mxu0 %vm380_vm0, %v351_v20  ;;  %5233 = vmatprep.subr.mxu1 %v736_v47 }
  0x27   : > { %5234 = vmatpush3.msra.mxu1 %v736_v47 }
  0x28   : > { %5235 = vmatprep.subr.mxu1 %v735_v48 }
  0x29   : > { %5178 = vmatmul.mubr.msk.f32.gmra.mxu0 %vm380_vm0, %v352_v21  ;;  %5236 = vmatpush3.msra.mxu1 %v735_v48 }
  0x2a   : > { %5180 = vmatprep.mubr.msk.f32.mxu0 %vm380_vm0, %v353_v22  ;;  %5237 = vmatprep.subr.mxu1 %v734_v49 }
  0x2b   : > { %5238 = vmatpush3.msra.mxu1 %v734_v49 }
  0x2d   : > { %5181 = vmatmul.mubr.msk.f32.gmra.mxu0 %vm380_vm0, %v354_v23 }
  0x2e   : > { %5183 = vmatprep.mubr.msk.f32.mxu0 %vm380_vm0, %v355_v24 }
  0x31   : > { %5184 = vmatmul.mubr.msk.f32.gmra.mxu0 %vm380_vm0, %v356_v25 }
  0x32   : > { %5186 = vmatprep.mubr.msk.f32.mxu0 %vm380_vm0, %v357_v26 }
  0x35   : > { %5187 = vmatmul.mubr.msk.f32.gmra.mxu0 %vm380_vm0, %v358_v27 }
  0x36   : > { %5189 = vmatprep.mubr.msk.f32.mxu0 %vm380_vm0, %v359_v28 }
  0x39   : > { %5190 = vmatmul.mubr.msk.f32.gmra.mxu0 %vm380_vm0, %v360_v29 }
  0x3a   : > { %5192 = vmatprep.mubr.msk.f32.mxu0 %vm380_vm0, %v361_v30 }
  0x3d   : > { %5193 = vmatmul.mubr.msk.f32.gmra.mxu0 %vm380_vm0, %v362_v31 }
  0x3e   : > { %5195 = vmatprep.mubr.msk.f32.mxu0 %vm380_vm0, %v363_v32 }
  0x41   : > { %5196 = vmatmul.mubr.msk.f32.gmra.mxu0 %vm380_vm0, %v364_v33 }
  0x42   : > { %5198 = vmatprep.mubr.msk.f32.mxu0 %vm380_vm0, %v365_v34 }
  0x45   : > { %5199 = vmatmul.mubr.msk.f32.gmra.mxu0 %vm380_vm0, %v366_v35 }
  0x46   : > { %5201 = vmatprep.mubr.msk.f32.mxu0 %vm380_vm0, %v367_v36 }
  0x49   : > { %5202 = vmatmul.mubr.msk.f32.gmra.mxu0 %vm380_vm0, %v368_v37 }
  0x4a   : > { %5204 = vmatprep.mubr.msk.f32.mxu0 %vm380_vm0, %v369_v38 }
  0x4d   : > { %5205 = vmatmul.mubr.msk.f32.gmra.mxu0 %vm380_vm0, %v370_v39 }
  0xd1   : > { %v5161_v51 = vpop.f32.mrf.mxu0 }
  0xd2   : > { %v549_v52 = vadd.f32 %v5161_v51, %v6573_v50 }
  0xd3   : > { %v543_v53 = vpop.f32.mrf.mxu0 }
  0xd4   : > { %v544_v54 = vadd.f32 %v6573_v50, %v543_v53 }
  0xd5   : > { %v5164_v55 = vpop.f32.mrf.mxu0 }
  0xd6   : > { %5967 = vtanh.f32 %v544_v54  ;;  %v559_v56 = vadd.f32 %v5164_v55, %v6573_v50 }
  0xd7   : > { %5969 = vtanh.f32 %v549_v52  ;;  %v553_v57 = vpop.f32.mrf.mxu0 }
  0xd8   : > { %v554_v58 = vadd.f32 %v6573_v50, %v553_v57 }
  0xd9   : > { %v5167_v59 = vpop.f32.mrf.mxu0 }
  0xda   : > { %5971 = vtanh.f32 %v554_v58  ;;  %v569_v60 = vadd.f32 %v5167_v59, %v6573_v50 }
  0xdb   : > { %5973 = vtanh.f32 %v559_v56  ;;  %v563_v61 = vpop.f32.mrf.mxu0 }
  0xdc   : > { %v564_v62 = vadd.f32 %v6573_v50, %v563_v61 }
  0xdd   : > { %v5170_v63 = vpop.f32.mrf.mxu0 }
  0xde   : > { %5975 = vtanh.f32 %v564_v62  ;;  %v579_v0 = vadd.f32 %v5170_v63, %v6573_v50 }
  0xdf   : > { %5977 = vtanh.f32 %v569_v60  ;;  %v573_v1 = vpop.f32.mrf.mxu0 }
  0xe0   : > { %v574_v2 = vadd.f32 %v6573_v50, %v573_v1 }
  0xe1   : > { %v5173_v3 = vpop.f32.mrf.mxu0 }
  0xe2   : > { %5979 = vtanh.f32 %v574_v2  ;;  %v589_v5 = vadd.f32 %v5173_v3, %v6573_v50 }
  0xe3   : > { %v5968_v4 = vpop.eup %5967  ;;  %5981 = vtanh.f32 %v579_v0  ;;  %v583_v6 = vpop.f32.mrf.mxu0 }
  0xe4   : > { %v5970_v7 = vpop.eup %5969  ;;  %v584_v8 = vadd.f32 %v6573_v50, %v583_v6  ;;  %5239 = vmatprep.mubr.f32.mxu1 %v5968_v4 }
  0xe5   : > { %v5176_v9 = vpop.f32.mrf.mxu0  ;;  %5240 = vmatmul.mubr.f32.vlgmr.msra.gmra.mxu1 %v5970_v7 }
  0xe6   : > { %5983 = vtanh.f32 %v584_v8  ;;  %v599_v11 = vadd.f32 %v5176_v9, %v6573_v50 }
  0xe7   : > { %v5972_v10 = vpop.eup %5971  ;;  %5985 = vtanh.f32 %v589_v5  ;;  %v593_v12 = vpop.f32.mrf.mxu0 }
  0xe8   : > { %v5974_v13 = vpop.eup %5973  ;;  %v594_v14 = vadd.f32 %v6573_v50, %v593_v12  ;;  %5242 = vmatprep.mubr.f32.mxu1 %v5972_v10 }
  0xe9   : > { %v5179_v15 = vpop.f32.mrf.mxu0  ;;  %5243 = vmatmul.mubr.f32.gmra.mxu1 %v5974_v13 }
  0xea   : > { %5987 = vtanh.f32 %v594_v14  ;;  %v609_v17 = vadd.f32 %v5179_v15, %v6573_v50 }
  0xeb   : > { %v5976_v16 = vpop.eup %5975  ;;  %5989 = vtanh.f32 %v599_v11  ;;  %v603_v18 = vpop.f32.mrf.mxu0 }
  0xec   : > { %v5978_v19 = vpop.eup %5977  ;;  %v604_v20 = vadd.f32 %v6573_v50, %v603_v18  ;;  %5245 = vmatprep.mubr.f32.mxu1 %v5976_v16 }
  0xed   : > { %v5182_v21 = vpop.f32.mrf.mxu0  ;;  %5246 = vmatmul.mubr.f32.gmra.mxu1 %v5978_v19 }
  0xee   : > { %5991 = vtanh.f32 %v604_v20  ;;  %v619_v23 = vadd.f32 %v5182_v21, %v6573_v50  ;;  %v1048_v20 = vld [vmem:[%s7334_s6 + $0x10] sm:$0xff]  ;;  %v1047_v21 = vld [vmem:[%s7334_s6 + $0x8] sm:$0xff] }
  0xef   : > { %v5980_v22 = vpop.eup %5979  ;;  %5993 = vtanh.f32 %v609_v17  ;;  %v613_v24 = vpop.f32.mrf.mxu0 }
  0xf0   : > { %v5982_v25 = vpop.eup %5981  ;;  %v614_v26 = vadd.f32 %v6573_v50, %v613_v24  ;;  %5248 = vmatprep.mubr.f32.mxu1 %v5980_v22  ;;  %v1046_v22 = vld [vmem:[%s7334_s6] sm:$0xff] }
  0xf1   : > { %v5185_v27 = vpop.f32.mrf.mxu0  ;;  %5249 = vmatmul.mubr.f32.gmra.mxu1 %v5982_v25 }
  0xf2   : > { %5995 = vtanh.f32 %v614_v26  ;;  %v629_v29 = vadd.f32 %v5185_v27, %v6573_v50 }
  0xf3   : > { %v5984_v28 = vpop.eup %5983  ;;  %5997 = vtanh.f32 %v619_v23  ;;  %v623_v30 = vpop.f32.mrf.mxu0  ;;  %v6622_v23 = vld [vmem:[%s7333_s5] ss:$0 sm:$0xff] }
  0xf4   : > { %v5986_v31 = vpop.eup %5985  ;;  %v624_v32 = vadd.f32 %v6573_v50, %v623_v30  ;;  %5251 = vmatprep.mubr.f32.mxu1 %v5984_v28 }
  0xf5   : > { %v5188_v33 = vpop.f32.mrf.mxu0  ;;  %5252 = vmatmul.mubr.f32.gmra.mxu1 %v5986_v31 }
  0xf6   : > { %5999 = vtanh.f32 %v624_v32  ;;  %v639_v35 = vadd.f32 %v5188_v33, %v6573_v50 }
  0xf7   : > { %v5988_v34 = vpop.eup %5987  ;;  %6001 = vtanh.f32 %v629_v29  ;;  %v633_v36 = vpop.f32.mrf.mxu0 }
  0xf8   : > { %v5990_v37 = vpop.eup %5989  ;;  %v634_v38 = vadd.f32 %v6573_v50, %v633_v36  ;;  %5254 = vmatprep.mubr.f32.mxu1 %v5988_v34 }
  0xf9   : > { %v5191_v39 = vpop.f32.mrf.mxu0  ;;  %5255 = vmatmul.mubr.f32.gmra.mxu1 %v5990_v37 }
  0xfa   : > { %6003 = vtanh.f32 %v634_v38  ;;  %v649_v41 = vadd.f32 %v5191_v39, %v6573_v50 }
  0xfb   : > { %v5992_v40 = vpop.eup %5991  ;;  %6005 = vtanh.f32 %v639_v35  ;;  %v643_v42 = vpop.f32.mrf.mxu0 }
  0xfc   : > { %v5994_v43 = vpop.eup %5993  ;;  %v644_v44 = vadd.f32 %v6573_v50, %v643_v42  ;;  %5257 = vmatprep.mubr.f32.mxu1 %v5992_v40 }
  0xfd   : > { %v5194_v45 = vpop.f32.mrf.mxu0  ;;  %5258 = vmatmul.mubr.f32.gmra.mxu1 %v5994_v43 }
  0xfe   : > { %6007 = vtanh.f32 %v644_v44  ;;  %v659_v47 = vadd.f32 %v5194_v45, %v6573_v50 }
  0xff   : > { %v5996_v46 = vpop.eup %5995  ;;  %6009 = vtanh.f32 %v649_v41  ;;  %v653_v48 = vpop.f32.mrf.mxu0 }
 0x100   : > { %v5998_v49 = vpop.eup %5997  ;;  %v654_v51 = vadd.f32 %v6573_v50, %v653_v48  ;;  %5260 = vmatprep.mubr.f32.mxu1 %v5996_v46 }
 0x101   : > { %v5197_v52 = vpop.f32.mrf.mxu0  ;;  %5261 = vmatmul.mubr.f32.gmra.mxu1 %v5998_v49 }
 0x102   : > { %6011 = vtanh.f32 %v654_v51  ;;  %v669_v54 = vadd.f32 %v5197_v52, %v6573_v50 }
 0x103   : > { %v6000_v53 = vpop.eup %5999  ;;  %6013 = vtanh.f32 %v659_v47  ;;  %v663_v55 = vpop.f32.mrf.mxu0 }
 0x104   : > { %v6002_v56 = vpop.eup %6001  ;;  %v664_v57 = vadd.f32 %v6573_v50, %v663_v55  ;;  %5263 = vmatprep.mubr.f32.mxu1 %v6000_v53 }
 0x105   : > { %v5200_v58 = vpop.f32.mrf.mxu0  ;;  %5264 = vmatmul.mubr.f32.gmra.mxu1 %v6002_v56 }
 0x106   : > { %6015 = vtanh.f32 %v664_v57  ;;  %v679_v60 = vadd.f32 %v5200_v58, %v6573_v50 }
 0x107   : > { %v6004_v59 = vpop.eup %6003  ;;  %6017 = vtanh.f32 %v669_v54  ;;  %v673_v61 = vpop.f32.mrf.mxu0 }
 0x108   : > { %v6006_v62 = vpop.eup %6005  ;;  %v674_v63 = vadd.f32 %v6573_v50, %v673_v61  ;;  %5266 = vmatprep.mubr.f32.mxu1 %v6004_v59 }
 0x109   : > { %v5203_v0 = vpop.f32.mrf.mxu0  ;;  %5267 = vmatmul.mubr.f32.gmra.mxu1 %v6006_v62 }
 0x10a   : > { %6019 = vtanh.f32 %v674_v63  ;;  %v689_v2 = vadd.f32 %v5203_v0, %v6573_v50 }
 0x10b   : > { %v6008_v1 = vpop.eup %6007  ;;  %6021 = vtanh.f32 %v679_v60  ;;  %v683_v3 = vpop.f32.mrf.mxu0 }
 0x10c   : > { %v6010_v4 = vpop.eup %6009  ;;  %v684_v5 = vadd.f32 %v6573_v50, %v683_v3  ;;  %5269 = vmatprep.mubr.f32.mxu1 %v6008_v1 }
 0x10d   : > { %v5206_v6 = vpop.f32.mrf.mxu0  ;;  %5270 = vmatmul.mubr.f32.gmra.mxu1 %v6010_v4 }
 0x10e   : > { %6023 = vtanh.f32 %v684_v5  ;;  %v699_v8 = vadd.f32 %v5206_v6, %v6573_v50 }
 0x10f   : > { %v6012_v7 = vpop.eup %6011  ;;  %6025 = vtanh.f32 %v689_v2  ;;  %v693_v9 = vpop.f32.mrf.mxu0 }
 0x110   : > { %v6014_v10 = vpop.eup %6013  ;;  %v694_v11 = vadd.f32 %v6573_v50, %v693_v9  ;;  %5272 = vmatprep.mubr.f32.mxu1 %v6012_v7  ;;  %v1049_v50 = vld [vmem:[%s7334_s6 + $0x18] sm:$0xff] }
 0x111   : > { %5273 = vmatmul.mubr.f32.gmra.mxu1 %v6014_v10  ;;  %5287 = vmatprep.subr.mxu0 %v1049_v50 }
 0x112   : > { %6027 = vtanh.f32 %v694_v11  ;;  %5288 = vmatpush3.msra.mxu0 %v1049_v50 }
 0x113   : > { %v6016_v12 = vpop.eup %6015  ;;  %6029 = vtanh.f32 %v699_v8  ;;  %5289 = vmatprep.subr.mxu0 %v1048_v20 }
 0x114   : > { %v6018_v13 = vpop.eup %6017  ;;  %5275 = vmatprep.mubr.f32.mxu1 %v6016_v12  ;;  %5290 = vmatpush3.msra.mxu0 %v1048_v20 }
 0x115   : > { %5276 = vmatmul.mubr.f32.gmra.mxu1 %v6018_v13  ;;  %5291 = vmatprep.subr.mxu0 %v1047_v21 }
 0x116   : > { %5292 = vmatpush3.msra.mxu0 %v1047_v21 }
 0x117   : > { %v6020_v14 = vpop.eup %6019  ;;  %5293 = vmatprep.subr.mxu0 %v1046_v22 }
 0x118   : > { %v6022_v15 = vpop.eup %6021  ;;  %5278 = vmatprep.mubr.f32.mxu1 %v6020_v14  ;;  %5294 = vmatpush3.msra.mxu0 %v1046_v22 }
 0x119   : > { %5279 = vmatmul.mubr.f32.gmra.mxu1 %v6022_v15 }
 0x11b   : > { %v6024_v16 = vpop.eup %6023 }
 0x11c   : > { %v6026_v17 = vpop.eup %6025  ;;  %5281 = vmatprep.mubr.f32.mxu1 %v6024_v16 }
 0x11d   : > { %5282 = vmatmul.mubr.f32.gmra.mxu1 %v6026_v17 }
 0x11f   : > { %v6028_v18 = vpop.eup %6027 }
 0x120   : > { %v6030_v19 = vpop.eup %6029  ;;  %5284 = vmatprep.mubr.f32.mxu1 %v6028_v18 }
 0x121   : > { %5285 = vmatmul.mubr.f32.gmra.mxu1 %v6030_v19 }
 0x1a5   : > { %v5241_v24 = vpop.f32.mrf.mxu1 }
 0x1a6   : > { %v829_v25 = vadd.f32 %v5241_v24, %v6622_v23 }
 0x1a7   : > { %v823_v26 = vpop.f32.mrf.mxu1 }
 0x1a8   : > { %v824_v27 = vadd.f32 %v6622_v23, %v823_v26 }
 0x1a9   : > { %v5244_v28 = vpop.f32.mrf.mxu1 }
 0x1aa   : > { %6031 = vtanh.f32 %v824_v27  ;;  %v839_v29 = vadd.f32 %v5244_v28, %v6622_v23 }
 0x1ab   : > { %6033 = vtanh.f32 %v829_v25  ;;  %v833_v30 = vpop.f32.mrf.mxu1 }
 0x1ac   : > { %v834_v31 = vadd.f32 %v6622_v23, %v833_v30 }
 0x1ad   : > { %v5247_v32 = vpop.f32.mrf.mxu1 }
 0x1ae   : > { %6035 = vtanh.f32 %v834_v31  ;;  %v849_v33 = vadd.f32 %v5247_v32, %v6622_v23 }
 0x1af   : > { %6037 = vtanh.f32 %v839_v29  ;;  %v843_v34 = vpop.f32.mrf.mxu1 }
 0x1b0   : > { %v844_v35 = vadd.f32 %v6622_v23, %v843_v34 }
 0x1b1   : > { %v5250_v36 = vpop.f32.mrf.mxu1 }
 0x1b2   : > { %6039 = vtanh.f32 %v844_v35  ;;  %v859_v37 = vadd.f32 %v5250_v36, %v6622_v23 }
 0x1b3   : > { %6041 = vtanh.f32 %v849_v33  ;;  %v853_v38 = vpop.f32.mrf.mxu1 }
 0x1b4   : > { %v854_v39 = vadd.f32 %v6622_v23, %v853_v38 }
 0x1b5   : > { %v5253_v40 = vpop.f32.mrf.mxu1 }
 0x1b6   : > { %6043 = vtanh.f32 %v854_v39  ;;  %v869_v42 = vadd.f32 %v5253_v40, %v6622_v23 }
 0x1b7   : > { %v6032_v41 = vpop.eup %6031  ;;  %6045 = vtanh.f32 %v859_v37  ;;  %v863_v43 = vpop.f32.mrf.mxu1 }
 0x1b8   : > { %v6034_v44 = vpop.eup %6033  ;;  %v864_v45 = vadd.f32 %v6622_v23, %v863_v43  ;;  %5295 = vmatprep.mubr.msk.f32.mxu0 %vm1050_vm1, %v6032_v41 }
 0x1b9   : > { %v5256_v46 = vpop.f32.mrf.mxu1  ;;  %5296 = vmatmul.mubr.msk.f32.vlgmr.msra.gmra.mxu0 %vm1050_vm1, %v6034_v44 }
 0x1ba   : > { %6047 = vtanh.f32 %v864_v45  ;;  %v879_v48 = vadd.f32 %v5256_v46, %v6622_v23 }
 0x1bb   : > { %v6036_v47 = vpop.eup %6035  ;;  %6049 = vtanh.f32 %v869_v42  ;;  %v873_v49 = vpop.f32.mrf.mxu1 }
 0x1bc   : > { %v6038_v51 = vpop.eup %6037  ;;  %v874_v52 = vadd.f32 %v6622_v23, %v873_v49  ;;  %5298 = vmatprep.mubr.msk.f32.mxu0 %vm1050_vm1, %v6036_v47 }
 0x1bd   : > { %v5259_v53 = vpop.f32.mrf.mxu1  ;;  %5299 = vmatmul.mubr.msk.f32.gmra.mxu0 %vm1050_vm1, %v6038_v51 }
 0x1be   : > { %6051 = vtanh.f32 %v874_v52  ;;  %v889_v55 = vadd.f32 %v5259_v53, %v6622_v23 }
 0x1bf   : > { %v6040_v54 = vpop.eup %6039  ;;  %6053 = vtanh.f32 %v879_v48  ;;  %v883_v56 = vpop.f32.mrf.mxu1 }
 0x1c0   : > { %v6042_v57 = vpop.eup %6041  ;;  %v884_v58 = vadd.f32 %v6622_v23, %v883_v56  ;;  %5301 = vmatprep.mubr.msk.f32.mxu0 %vm1050_vm1, %v6040_v54 }
 0x1c1   : > { %v5262_v59 = vpop.f32.mrf.mxu1  ;;  %5302 = vmatmul.mubr.msk.f32.gmra.mxu0 %vm1050_vm1, %v6042_v57  ;;  %v6695_v57 = vld [vmem:[%s6692_s22] sm:$0xff] }
 0x1c2   : > { %6055 = vtanh.f32 %v884_v58  ;;  %v899_v61 = vadd.f32 %v5262_v59, %v6622_v23  ;;  %5359 = vmatprep.mubr.msk.f32.mxu1 %vm1372_vm2, %v6695_v57  ;;  %v6700_v58 = vld [vmem:[%s6692_s22 + $0xc0] sm:$0xff] }
 0x1c3   : > { %v6044_v60 = vpop.eup %6043  ;;  %6057 = vtanh.f32 %v889_v55  ;;  %v893_v62 = vpop.f32.mrf.mxu1 }
 0x1c4   : > { %v6046_v63 = vpop.eup %6045  ;;  %v894_v0 = vadd.f32 %v6622_v23, %v893_v62  ;;  %5304 = vmatprep.mubr.msk.f32.mxu0 %vm1050_vm1, %v6044_v60 }
 0x1c5   : > { %v5265_v1 = vpop.f32.mrf.mxu1  ;;  %5305 = vmatmul.mubr.msk.f32.gmra.mxu0 %vm1050_vm1, %v6046_v63 }
 0x1c6   : > { %6059 = vtanh.f32 %v894_v0  ;;  %v909_v3 = vadd.f32 %v5265_v1, %v6622_v23 }
 0x1c7   : > { %v6048_v2 = vpop.eup %6047  ;;  %6061 = vtanh.f32 %v899_v61  ;;  %v903_v4 = vpop.f32.mrf.mxu1 }
 0x1c8   : > { %v6050_v5 = vpop.eup %6049  ;;  %v904_v6 = vadd.f32 %v6622_v23, %v903_v4  ;;  %5307 = vmatprep.mubr.msk.f32.mxu0 %vm1050_vm1, %v6048_v2 }
 0x1c9   : > { %v5268_v7 = vpop.f32.mrf.mxu1  ;;  %5308 = vmatmul.mubr.msk.f32.gmra.mxu0 %vm1050_vm1, %v6050_v5 }
 0x1ca   : > { %6063 = vtanh.f32 %v904_v6  ;;  %v919_v9 = vadd.f32 %v5268_v7, %v6622_v23 }
 0x1cb   : > { %v6052_v8 = vpop.eup %6051  ;;  %6065 = vtanh.f32 %v909_v3  ;;  %v913_v10 = vpop.f32.mrf.mxu1 }
 0x1cc   : > { %v6054_v11 = vpop.eup %6053  ;;  %v914_v12 = vadd.f32 %v6622_v23, %v913_v10  ;;  %5310 = vmatprep.mubr.msk.f32.mxu0 %vm1050_vm1, %v6052_v8  ;;  %v6708_v10 = vld [vmem:[%s6692_s22 + $0x10] sm:$0xff] }
 0x1cd   : > { %v5271_v13 = vpop.f32.mrf.mxu1  ;;  %5311 = vmatmul.mubr.msk.f32.gmra.mxu0 %vm1050_vm1, %v6054_v11 }
 0x1ce   : > { %6067 = vtanh.f32 %v914_v12  ;;  %v929_v15 = vadd.f32 %v5271_v13, %v6622_v23  ;;  %v6715_v13 = vld [vmem:[%s6692_s22 + $0x18] sm:$0xff] }
 0x1cf   : > { %v6056_v14 = vpop.eup %6055  ;;  %6069 = vtanh.f32 %v919_v9  ;;  %v923_v16 = vpop.f32.mrf.mxu1  ;;  %v6705_v9 = vld [vmem:[%s6692_s22 + $0x8] sm:$0xff] }
 0x1d0   : > { %v6058_v17 = vpop.eup %6057  ;;  %v924_v18 = vadd.f32 %v6622_v23, %v923_v16  ;;  %5313 = vmatprep.mubr.msk.f32.mxu0 %vm1050_vm1, %v6056_v14  ;;  %v6718_v14 = vld [vmem:[%s6692_s22 + $0x20] sm:$0xff] }
 0x1d1   : > { %v5274_v19 = vpop.f32.mrf.mxu1  ;;  %5314 = vmatmul.mubr.msk.f32.gmra.mxu0 %vm1050_vm1, %v6058_v17  ;;  %v6729_v17 = vld [vmem:[%s6692_s22 + $0x28] sm:$0xff] }
 0x1d2   : > { %6071 = vtanh.f32 %v924_v18  ;;  %v939_v20 = vadd.f32 %v5274_v19, %v6622_v23  ;;  %v6732_v18 = vld [vmem:[%s6692_s22 + $0x30] sm:$0xff] }
 0x1d3   : > { %v6060_v50 = vpop.eup %6059  ;;  %6073 = vtanh.f32 %v929_v15  ;;  %v933_v21 = vpop.f32.mrf.mxu1 }
 0x1d4   : > { %v6062_v22 = vpop.eup %6061  ;;  %v934_v24 = vadd.f32 %v6622_v23, %v933_v21  ;;  %5316 = vmatprep.mubr.msk.f32.mxu0 %vm1050_vm1, %v6060_v50  ;;  %v6742_v21 = vld [vmem:[%s6692_s22 + $0x40] sm:$0xff] }
 0x1d5   : > { %v5277_v25 = vpop.f32.mrf.mxu1  ;;  %5317 = vmatmul.mubr.msk.f32.gmra.mxu0 %vm1050_vm1, %v6062_v22 }
 0x1d6   : > { %6075 = vtanh.f32 %v934_v24  ;;  %v949_v27 = vadd.f32 %v5277_v25, %v6622_v23  ;;  %v6749_v25 = vld [vmem:[%s6692_s22 + $0x48] sm:$0xff] }
 0x1d7   : > { %v6064_v26 = vpop.eup %6063  ;;  %6077 = vtanh.f32 %v939_v20  ;;  %v943_v28 = vpop.f32.mrf.mxu1  ;;  %v6739_v20 = vld [vmem:[%s6692_s22 + $0x38] sm:$0xff] }
 0x1d8   : > { %v6066_v29 = vpop.eup %6065  ;;  %v944_v30 = vadd.f32 %v6622_v23, %v943_v28  ;;  %5319 = vmatprep.mubr.msk.f32.mxu0 %vm1050_vm1, %v6064_v26  ;;  %v6752_v26 = vld [vmem:[%s6692_s22 + $0x50] sm:$0xff] }
 0x1d9   : > { %v5280_v31 = vpop.f32.mrf.mxu1  ;;  %5320 = vmatmul.mubr.msk.f32.gmra.mxu0 %vm1050_vm1, %v6066_v29  ;;  %v6759_v29 = vld [vmem:[%s6692_s22 + $0x58] sm:$0xff] }
 0x1da   : > { %6079 = vtanh.f32 %v944_v30  ;;  %v959_v33 = vadd.f32 %v5280_v31, %v6622_v23  ;;  %v6762_v30 = vld [vmem:[%s6692_s22 + $0x60] sm:$0xff] }
 0x1db   : > { %v6068_v32 = vpop.eup %6067  ;;  %6081 = vtanh.f32 %v949_v27  ;;  %v953_v34 = vpop.f32.mrf.mxu1 }
 0x1dc   : > { %v6070_v35 = vpop.eup %6069  ;;  %v954_v36 = vadd.f32 %v6622_v23, %v953_v34  ;;  %5322 = vmatprep.mubr.msk.f32.mxu0 %vm1050_vm1, %v6068_v32  ;;  %v6772_v34 = vld [vmem:[%s6692_s22 + $0x70] sm:$0xff] }
 0x1dd   : > { %v5283_v37 = vpop.f32.mrf.mxu1  ;;  %5323 = vmatmul.mubr.msk.f32.gmra.mxu0 %vm1050_vm1, %v6070_v35 }
 0x1de   : > { %6083 = vtanh.f32 %v954_v36  ;;  %v969_v39 = vadd.f32 %v5283_v37, %v6622_v23  ;;  %v6779_v37 = vld [vmem:[%s6692_s22 + $0x78] sm:$0xff] }
 0x1df   : > { %v6072_v38 = vpop.eup %6071  ;;  %6085 = vtanh.f32 %v959_v33  ;;  %v963_v40 = vpop.f32.mrf.mxu1  ;;  %v6769_v33 = vld [vmem:[%s6692_s22 + $0x68] sm:$0xff] }
 0x1e0   : > { %v6074_v41 = vpop.eup %6073  ;;  %v964_v42 = vadd.f32 %v6622_v23, %v963_v40  ;;  %5325 = vmatprep.mubr.msk.f32.mxu0 %vm1050_vm1, %v6072_v38  ;;  %v6782_v38 = vld [vmem:[%s6692_s22 + $0x80] sm:$0xff] }
 0x1e1   : > { %v5286_v43 = vpop.f32.mrf.mxu1  ;;  %5326 = vmatmul.mubr.msk.f32.gmra.mxu0 %vm1050_vm1, %v6074_v41  ;;  %v6791_v41 = vld [vmem:[%s6692_s22 + $0x88] sm:$0xff] }
 0x1e2   : > { %6087 = vtanh.f32 %v964_v42  ;;  %v979_v45 = vadd.f32 %v5286_v43, %v6622_v23  ;;  %v6795_v42 = vld [vmem:[%s6692_s22 + $0x90] sm:$0xff] }
 0x1e3   : > { %v6076_v44 = vpop.eup %6075  ;;  %6089 = vtanh.f32 %v969_v39  ;;  %v973_v46 = vpop.f32.mrf.mxu1 }
 0x1e4   : > { %v6078_v47 = vpop.eup %6077  ;;  %v974_v48 = vadd.f32 %v6622_v23, %v973_v46  ;;  %5328 = vmatprep.mubr.msk.f32.mxu0 %vm1050_vm1, %v6076_v44  ;;  %v6806_v46 = vld [vmem:[%s6692_s22 + $0xa0] sm:$0xff] }
 0x1e5   : > { %5329 = vmatmul.mubr.msk.f32.gmra.mxu0 %vm1050_vm1, %v6078_v47  ;;  %v6813_v47 = vld [vmem:[%s6692_s22 + $0xa8] sm:$0xff] }
 0x1e6   : > { %6091 = vtanh.f32 %v974_v48  ;;  %v6816_v48 = vld [vmem:[%s6692_s22 + $0xb0] sm:$0xff] }
 0x1e7   : > { %v6080_v49 = vpop.eup %6079  ;;  %6093 = vtanh.f32 %v979_v45  ;;  %v6803_v45 = vld [vmem:[%s6692_s22 + $0x98] sm:$0xff] }
 0x1e8   : > { %v6082_v51 = vpop.eup %6081  ;;  %5331 = vmatprep.mubr.msk.f32.mxu0 %vm1050_vm1, %v6080_v49  ;;  %v6823_v49 = vld [vmem:[%s6692_s22 + $0xb8] sm:$0xff] }
 0x1e9   : > { %5332 = vmatmul.mubr.msk.f32.gmra.mxu0 %vm1050_vm1, %v6082_v51  ;;  %v6828_v51 = vld [vmem:[%s6692_s22 + $0xc8] sm:$0xff] }
 0x1eb   : > { %v6084_v52 = vpop.eup %6083 }
 0x1ec   : > { %v6086_v53 = vpop.eup %6085  ;;  %5334 = vmatprep.mubr.msk.f32.mxu0 %vm1050_vm1, %v6084_v52  ;;  %v6831_v52 = vld [vmem:[%s6692_s22 + $0xd0] sm:$0xff] }
 0x1ed   : > { %5335 = vmatmul.mubr.msk.f32.gmra.mxu0 %vm1050_vm1, %v6086_v53  ;;  %v6838_v53 = vld [vmem:[%s6692_s22 + $0xd8] sm:$0xff] }
 0x1ef   : > { %v6088_v23 = vpop.eup %6087 }
 0x1f0   : > { %v6090_v54 = vpop.eup %6089  ;;  %5337 = vmatprep.mubr.msk.f32.mxu0 %vm1050_vm1, %v6088_v23  ;;  %v6841_v23 = vld [vmem:[%s6692_s22 + $0xe0] sm:$0xff] }
 0x1f1   : > { %5338 = vmatmul.mubr.msk.f32.gmra.mxu0 %vm1050_vm1, %v6090_v54  ;;  %v6848_v54 = vld [vmem:[%s6692_s22 + $0xe8] sm:$0xff] }
 0x1f3   : > { %v6092_v55 = vpop.eup %6091 }
 0x1f4   : > { %v6094_v56 = vpop.eup %6093  ;;  %5340 = vmatprep.mubr.msk.f32.mxu0 %vm1050_vm1, %v6092_v55  ;;  %v6851_v55 = vld [vmem:[%s6692_s22 + $0xf0] sm:$0xff] }
 0x1f5   : > { %5341 = vmatmul.mubr.msk.f32.gmra.mxu0 %vm1050_vm1, %v6094_v56  ;;  %v6858_v56 = vld [vmem:[%s6692_s22 + $0xf8] sm:$0xff] }
 0x1f6   : > { %5443 = vmatprep.mubr.msk.f32.mxu0 %vm1372_vm2, %v6700_v58 }
 0x279   : > { %v5297_v59 = vpop.f32.mrf.mxu0 }
 0x27b   : > { %v1213_v60 = vpop.f32.mrf.mxu0 }
 0x27d   : > { %v5300_v61 = vpop.f32.mrf.mxu0 }
 0x27f   : > { %v1223_v62 = vpop.f32.mrf.mxu0 }
 0x281   : > { %v5303_v63 = vpop.f32.mrf.mxu0 }
 0x283   : > { %v1233_v0 = vpop.f32.mrf.mxu0 }
 0x285   : > { %v5306_v1 = vpop.f32.mrf.mxu0 }
 0x286   : > { %5343 = vmatprep.subr.mxu1 %v5306_v1 }
 0x287   : > { %v1243_v2 = vpop.f32.mrf.mxu0  ;;  %5344 = vmatpush3.msra.mxu1 %v5306_v1 }
 0x288   : > { %5345 = vmatprep.subr.mxu1 %v1243_v2 }
 0x289   : > { %v5309_v3 = vpop.f32.mrf.mxu0  ;;  %5346 = vmatpush3.msra.mxu1 %v1243_v2 }
 0x28a   : > { %5347 = vmatprep.subr.mxu1 %v5303_v63 }
 0x28b   : > { %v1253_v4 = vpop.f32.mrf.mxu0  ;;  %5348 = vmatpush3.msra.mxu1 %v5303_v63 }
 0x28c   : > { %5349 = vmatprep.subr.mxu1 %v1233_v0 }
 0x28d   : > { %v5312_v5 = vpop.f32.mrf.mxu0  ;;  %5350 = vmatpush3.msra.mxu1 %v1233_v0 }
 0x28e   : > { %5351 = vmatprep.subr.mxu1 %v5300_v61 }
 0x28f   : > { %v1263_v6 = vpop.f32.mrf.mxu0  ;;  %5352 = vmatpush3.msra.mxu1 %v5300_v61  ;;  %v4469_v61 = vld [vmem:[%s7334_s6 + $0x28] sm:$0xff] }
 0x290   : > { %5353 = vmatprep.subr.mxu1 %v1223_v62 }
 0x291   : > { %v5315_v7 = vpop.f32.mrf.mxu0  ;;  %5354 = vmatpush3.msra.mxu1 %v1223_v62  ;;  %v4468_v62 = vld [vmem:[%s7334_s6 + $0x20] sm:$0xff] }
 0x292   : > { %5355 = vmatprep.subr.mxu1 %v5297_v59 }
 0x293   : > { %v1273_v8 = vpop.f32.mrf.mxu0  ;;  %5356 = vmatpush3.msra.mxu1 %v5297_v59  ;;  %v4471_v59 = vld [vmem:[%s7334_s6 + $0x38] sm:$0xff] }
 0x294   : > { %5357 = vmatprep.subr.mxu1 %v1213_v60 }
 0x295   : > { %v5318_v11 = vpop.f32.mrf.mxu0  ;;  %5358 = vmatpush3.msra.mxu1 %v1213_v60  ;;  %v4470_v60 = vld [vmem:[%s7334_s6 + $0x30] sm:$0xff] }
 0x296   : > { %5371 = vmatprep.subr.mxu1 %v5318_v11  ;;  %5360 = vmatmul.mubr.msk.f32.vlgmr.msra.gmra.mxu1 %vm1372_vm2, %v6705_v9 }
 0x297   : > { %v1283_v12 = vpop.f32.mrf.mxu0  ;;  %5372 = vmatpush3.msra.mxu1 %v5318_v11  ;;  %5362 = vmatprep.mubr.msk.f32.mxu1 %vm1372_vm2, %v6708_v10 }
 0x298   : > { %5373 = vmatprep.subr.mxu1 %v1283_v12 }
 0x299   : > { %v6720_v15 = vpop.f32.mrf.mxu0  ;;  %5374 = vmatpush3.msra.mxu1 %v1283_v12 }
 0x29a   : > { %5375 = vmatprep.subr.mxu1 %v5315_v7  ;;  %5363 = vmatmul.mubr.msk.f32.gmra.mxu1 %vm1372_vm2, %v6715_v13 }
 0x29b   : > { %v6724_v16 = vpop.f32.mrf.mxu0  ;;  %5376 = vmatpush3.msra.mxu1 %v5315_v7  ;;  %5365 = vmatprep.mubr.msk.f32.mxu1 %vm1372_vm2, %v6718_v14 }
 0x29c   : > { %5377 = vmatprep.subr.mxu1 %v1273_v8 }
 0x29d   : > { %v5324_v19 = vpop.f32.mrf.mxu0  ;;  %5378 = vmatpush3.msra.mxu1 %v1273_v8 }
 0x29e   : > { %5379 = vmatprep.subr.mxu1 %v5312_v5  ;;  %5366 = vmatmul.mubr.msk.f32.gmra.mxu1 %vm1372_vm2, %v6729_v17 }
 0x29f   : > { %v1303_v50 = vpop.f32.mrf.mxu0  ;;  %5380 = vmatpush3.msra.mxu1 %v5312_v5  ;;  %5368 = vmatprep.mubr.msk.f32.mxu1 %vm1372_vm2, %v6732_v18 }
 0x2a0   : > { %5381 = vmatprep.subr.mxu1 %v1263_v6 }
 0x2a1   : > { %v5327_v22 = vpop.f32.mrf.mxu0  ;;  %5382 = vmatpush3.msra.mxu1 %v1263_v6 }
 0x2a2   : > { %5383 = vmatprep.subr.mxu1 %v5309_v3  ;;  %5369 = vmatmul.mubr.msk.f32.gmra.mxu1 %vm1372_vm2, %v6739_v20 }
 0x2a3   : > { %v1313_v24 = vpop.f32.mrf.mxu0  ;;  %5384 = vmatpush3.msra.mxu1 %v5309_v3  ;;  %5387 = vmatprep.mubr.msk.f32.mxu1 %vm1372_vm2, %v6742_v21 }
 0x2a4   : > { %5385 = vmatprep.subr.mxu1 %v1253_v4 }
 0x2a5   : > { %v5330_v27 = vpop.f32.mrf.mxu0  ;;  %5386 = vmatpush3.msra.mxu1 %v1253_v4 }
 0x2a6   : > { %5399 = vmatprep.subr.mxu1 %v5330_v27  ;;  %5388 = vmatmul.mubr.msk.f32.vlgmr.msra.gmra.mxu1 %vm1372_vm2, %v6749_v25 }
 0x2a7   : > { %v1323_v28 = vpop.f32.mrf.mxu0  ;;  %5400 = vmatpush3.msra.mxu1 %v5330_v27  ;;  %5390 = vmatprep.mubr.msk.f32.mxu1 %vm1372_vm2, %v6752_v26 }
 0x2a8   : > { %5401 = vmatprep.subr.mxu1 %v1323_v28 }
 0x2a9   : > { %v5333_v31 = vpop.f32.mrf.mxu0  ;;  %5402 = vmatpush3.msra.mxu1 %v1323_v28 }
 0x2aa   : > { %5403 = vmatprep.subr.mxu1 %v5327_v22  ;;  %5391 = vmatmul.mubr.msk.f32.gmra.mxu1 %vm1372_vm2, %v6759_v29 }
 0x2ab   : > { %v1333_v32 = vpop.f32.mrf.mxu0  ;;  %5404 = vmatpush3.msra.mxu1 %v5327_v22  ;;  %5393 = vmatprep.mubr.msk.f32.mxu1 %vm1372_vm2, %v6762_v30 }
 0x2ac   : > { %5405 = vmatprep.subr.mxu1 %v1313_v24 }
 0x2ad   : > { %v5336_v35 = vpop.f32.mrf.mxu0  ;;  %5406 = vmatpush3.msra.mxu1 %v1313_v24 }
 0x2ae   : > { %5407 = vmatprep.subr.mxu1 %v5324_v19  ;;  %5394 = vmatmul.mubr.msk.f32.gmra.mxu1 %vm1372_vm2, %v6769_v33 }
 0x2af   : > { %v1343_v36 = vpop.f32.mrf.mxu0  ;;  %5408 = vmatpush3.msra.mxu1 %v5324_v19  ;;  %5396 = vmatprep.mubr.msk.f32.mxu1 %vm1372_vm2, %v6772_v34 }
 0x2b0   : > { %5409 = vmatprep.subr.mxu1 %v1303_v50 }
 0x2b1   : > { %v5339_v39 = vpop.f32.mrf.mxu0  ;;  %5410 = vmatpush3.msra.mxu1 %v1303_v50 }
 0x2b2   : > { %5411 = vmatprep.subr.mxu1 %v6720_v15  ;;  %5397 = vmatmul.mubr.msk.f32.gmra.mxu1 %vm1372_vm2, %v6779_v37 }
 0x2b3   : > { %v1353_v40 = vpop.f32.mrf.mxu0  ;;  %5412 = vmatpush3.msra.mxu1 %v6720_v15  ;;  %5415 = vmatprep.mubr.msk.f32.mxu1 %vm1372_vm2, %v6782_v38 }
 0x2b4   : > { %5413 = vmatprep.subr.mxu1 %v6724_v16 }
 0x2b5   : > { %v5342_v43 = vpop.f32.mrf.mxu0  ;;  %5414 = vmatpush3.msra.mxu1 %v6724_v16 }
 0x2b6   : > { %5427 = vmatprep.subr.mxu0 %v5342_v43  ;;  %5416 = vmatmul.mubr.msk.f32.vlgmr.msra.gmra.mxu1 %vm1372_vm2, %v6791_v41 }
 0x2b7   : > { %v1363_v44 = vpop.f32.mrf.mxu0  ;;  %5428 = vmatpush3.msra.mxu0 %v5342_v43  ;;  %5418 = vmatprep.mubr.msk.f32.mxu1 %vm1372_vm2, %v6795_v42 }
 0x2b8   : > { %5429 = vmatprep.subr.mxu0 %v1363_v44  ;;  %5455 = vmatprep.subr.mxu1 %v4471_v59 }
 0x2b9   : > { %5430 = vmatpush3.msra.mxu0 %v1363_v44  ;;  %5456 = vmatpush3.msra.mxu1 %v4471_v59 }
 0x2ba   : > { %5431 = vmatprep.subr.mxu0 %v5339_v39  ;;  %5419 = vmatmul.mubr.msk.f32.gmra.mxu1 %vm1372_vm2, %v6803_v45 }
 0x2bb   : > { %5432 = vmatpush3.msra.mxu0 %v5339_v39  ;;  %5421 = vmatprep.mubr.msk.f32.mxu1 %vm1372_vm2, %v6806_v46 }
 0x2bc   : > { %5433 = vmatprep.subr.mxu0 %v1353_v40  ;;  %5457 = vmatprep.subr.mxu1 %v4470_v60 }
 0x2bd   : > { %5434 = vmatpush3.msra.mxu0 %v1353_v40  ;;  %5458 = vmatpush3.msra.mxu1 %v4470_v60 }
 0x2be   : > { %5435 = vmatprep.subr.mxu0 %v5336_v35  ;;  %5422 = vmatmul.mubr.msk.f32.gmra.mxu1 %vm1372_vm2, %v6813_v47 }
 0x2bf   : > { %5436 = vmatpush3.msra.mxu0 %v5336_v35  ;;  %5424 = vmatprep.mubr.msk.f32.mxu1 %vm1372_vm2, %v6816_v48 }
 0x2c0   : > { %5437 = vmatprep.subr.mxu0 %v1343_v36  ;;  %5459 = vmatprep.subr.mxu1 %v4469_v61 }
 0x2c1   : > { %5438 = vmatpush3.msra.mxu0 %v1343_v36  ;;  %5460 = vmatpush3.msra.mxu1 %v4469_v61 }
 0x2c2   : > { %5439 = vmatprep.subr.mxu0 %v5333_v31  ;;  %5425 = vmatmul.mubr.msk.f32.gmra.mxu1 %vm1372_vm2, %v6823_v49 }
 0x2c3   : > { %5440 = vmatpush3.msra.mxu0 %v5333_v31  ;;  %5461 = vmatprep.subr.mxu1 %v4468_v62 }
 0x2c4   : > { %5441 = vmatprep.subr.mxu0 %v1333_v32  ;;  %5462 = vmatpush3.msra.mxu1 %v4468_v62 }
 0x2c5   : > { %5442 = vmatpush3.msra.mxu0 %v1333_v32 }
 0x2c6   : > { %5444 = vmatmul.mubr.msk.f32.vlgmr.msra.gmra.mxu0 %vm1372_vm2, %v6828_v51 }
 0x2c7   : > { %5446 = vmatprep.mubr.msk.f32.mxu0 %vm1372_vm2, %v6831_v52 }
 0x2ca   : > { %5447 = vmatmul.mubr.msk.f32.gmra.mxu0 %vm1372_vm2, %v6838_v53 }
 0x2cb   : > { %5449 = vmatprep.mubr.msk.f32.mxu0 %vm1372_vm2, %v6841_v23 }
 0x2ce   : > { %5450 = vmatmul.mubr.msk.f32.gmra.mxu0 %vm1372_vm2, %v6848_v54 }
 0x2cf   : > { %5452 = vmatprep.mubr.msk.f32.mxu0 %vm1372_vm2, %v6851_v55 }
 0x2d2   : > { %5453 = vmatmul.mubr.msk.f32.gmra.mxu0 %vm1372_vm2, %v6858_v56 }
 0x2d3   : > { %5527 = vmatprep.mubr.msk.f32.mxu0 %vm1372_vm2, %v6695_v57 }
 0x356   : > { %v5361_v63 = vpop.f32.mrf.mxu1 }
 0x358   : > { %v1463_v0 = vpop.f32.mrf.mxu1 }
 0x359   : > { %6095 = vtanh.f32 %v1463_v0 }
 0x35a   : > { %6097 = vtanh.f32 %v5361_v63  ;;  %v5364_v1 = vpop.f32.mrf.mxu1 }
 0x35c   : > { %v1473_v2 = vpop.f32.mrf.mxu1 }
 0x35d   : > { %6099 = vtanh.f32 %v1473_v2 }
 0x35e   : > { %6101 = vtanh.f32 %v5364_v1  ;;  %v5367_v3 = vpop.f32.mrf.mxu1 }
 0x360   : > { %v1483_v4 = vpop.f32.mrf.mxu1 }
 0x361   : > { %6103 = vtanh.f32 %v1483_v4 }
 0x362   : > { %6105 = vtanh.f32 %v5367_v3  ;;  %v5370_v5 = vpop.f32.mrf.mxu1 }
 0x364   : > { %v1493_v6 = vpop.f32.mrf.mxu1 }
 0x365   : > { %6107 = vtanh.f32 %v1493_v6 }
 0x366   : > { %v6096_v7 = vpop.eup %6095  ;;  %6109 = vtanh.f32 %v5370_v5  ;;  %v5389_v8 = vpop.f32.mrf.mxu1 }
 0x367   : > { %v6098_v11 = vpop.eup %6097  ;;  %5463 = vmatprep.mubr.msk.f32.mxu1 %vm1050_vm1, %v6096_v7 }
 0x368   : > { %v1592_v12 = vpop.f32.mrf.mxu1  ;;  %5464 = vmatmul.mubr.msk.f32.vlgmr.msra.gmra.mxu1 %vm1050_vm1, %v6098_v11 }
 0x369   : > { %6111 = vtanh.f32 %v1592_v12 }
 0x36a   : > { %v6100_v15 = vpop.eup %6099  ;;  %6113 = vtanh.f32 %v5389_v8  ;;  %v5392_v16 = vpop.f32.mrf.mxu1 }
 0x36b   : > { %v6102_v19 = vpop.eup %6101  ;;  %5466 = vmatprep.mubr.msk.f32.mxu1 %vm1050_vm1, %v6100_v15 }
 0x36c   : > { %v1602_v50 = vpop.f32.mrf.mxu1  ;;  %5467 = vmatmul.mubr.msk.f32.gmra.mxu1 %vm1050_vm1, %v6102_v19 }
 0x36d   : > { %6115 = vtanh.f32 %v1602_v50 }
 0x36e   : > { %v6104_v22 = vpop.eup %6103  ;;  %6117 = vtanh.f32 %v5392_v16  ;;  %v5395_v24 = vpop.f32.mrf.mxu1 }
 0x36f   : > { %v6106_v27 = vpop.eup %6105  ;;  %5469 = vmatprep.mubr.msk.f32.mxu1 %vm1050_vm1, %v6104_v22 }
 0x370   : > { %v1612_v28 = vpop.f32.mrf.mxu1  ;;  %5470 = vmatmul.mubr.msk.f32.gmra.mxu1 %vm1050_vm1, %v6106_v27 }
 0x371   : > { %6119 = vtanh.f32 %v1612_v28 }
 0x372   : > { %v6108_v31 = vpop.eup %6107  ;;  %6121 = vtanh.f32 %v5395_v24  ;;  %v5398_v32 = vpop.f32.mrf.mxu1 }
 0x373   : > { %v6110_v35 = vpop.eup %6109  ;;  %5472 = vmatprep.mubr.msk.f32.mxu1 %vm1050_vm1, %v6108_v31 }
 0x374   : > { %v1622_v36 = vpop.f32.mrf.mxu1  ;;  %5473 = vmatmul.mubr.msk.f32.gmra.mxu1 %vm1050_vm1, %v6110_v35 }
 0x375   : > { %6123 = vtanh.f32 %v1622_v36 }
 0x376   : > { %v6112_v39 = vpop.eup %6111  ;;  %6125 = vtanh.f32 %v5398_v32  ;;  %v5417_v40 = vpop.f32.mrf.mxu1 }
 0x377   : > { %v6114_v43 = vpop.eup %6113  ;;  %5475 = vmatprep.mubr.msk.f32.mxu1 %vm1050_vm1, %v6112_v39 }
 0x378   : > { %v1721_v44 = vpop.f32.mrf.mxu1  ;;  %5476 = vmatmul.mubr.msk.f32.gmra.mxu1 %vm1050_vm1, %v6114_v43 }
 0x379   : > { %6127 = vtanh.f32 %v1721_v44 }
 0x37a   : > { %v6116_v59 = vpop.eup %6115  ;;  %6129 = vtanh.f32 %v5417_v40  ;;  %v5420_v60 = vpop.f32.mrf.mxu1 }
 0x37b   : > { %v6118_v61 = vpop.eup %6117  ;;  %5478 = vmatprep.mubr.msk.f32.mxu1 %vm1050_vm1, %v6116_v59 }
 0x37c   : > { %v1731_v62 = vpop.f32.mrf.mxu1  ;;  %5479 = vmatmul.mubr.msk.f32.gmra.mxu1 %vm1050_vm1, %v6118_v61 }
 0x37d   : > { %6131 = vtanh.f32 %v1731_v62 }
 0x37e   : > { %v6120_v63 = vpop.eup %6119  ;;  %6133 = vtanh.f32 %v5420_v60  ;;  %v5423_v0 = vpop.f32.mrf.mxu1 }
 0x37f   : > { %v6122_v1 = vpop.eup %6121  ;;  %5481 = vmatprep.mubr.msk.f32.mxu1 %vm1050_vm1, %v6120_v63  ;;  %v4539_v63 = vld [vmem:[%s7334_s6 + $0x58] sm:$0xff] }
 0x380   : > { %v1741_v2 = vpop.f32.mrf.mxu1  ;;  %5482 = vmatmul.mubr.msk.f32.gmra.mxu1 %vm1050_vm1, %v6122_v1  ;;  %5623 = vmatprep.subr.mxu1 %v4539_v63 }
 0x381   : > { %6135 = vtanh.f32 %v1741_v2  ;;  %5624 = vmatpush3.msra.mxu1 %v4539_v63 }
 0x382   : > { %v6124_v3 = vpop.eup %6123  ;;  %6137 = vtanh.f32 %v5423_v0  ;;  %v5426_v4 = vpop.f32.mrf.mxu1 }
 0x383   : > { %v6126_v5 = vpop.eup %6125  ;;  %5484 = vmatprep.mubr.msk.f32.mxu1 %vm1050_vm1, %v6124_v3 }
 0x384   : > { %v1751_v6 = vpop.f32.mrf.mxu1  ;;  %5485 = vmatmul.mubr.msk.f32.gmra.mxu1 %vm1050_vm1, %v6126_v5 }
 0x385   : > { %6139 = vtanh.f32 %v1751_v6 }
 0x386   : > { %v6128_v7 = vpop.eup %6127  ;;  %6141 = vtanh.f32 %v5426_v4  ;;  %v5445_v8 = vpop.f32.mrf.mxu0 }
 0x387   : > { %v6130_v11 = vpop.eup %6129  ;;  %5487 = vmatprep.mubr.msk.f32.mxu1 %vm1050_vm1, %v6128_v7 }
 0x388   : > { %v1850_v12 = vpop.f32.mrf.mxu0  ;;  %5488 = vmatmul.mubr.msk.f32.gmra.mxu1 %vm1050_vm1, %v6130_v11 }
 0x389   : > { %6143 = vtanh.f32 %v1850_v12 }
 0x38a   : > { %v6132_v15 = vpop.eup %6131  ;;  %6145 = vtanh.f32 %v5445_v8  ;;  %v5448_v16 = vpop.f32.mrf.mxu0 }
 0x38b   : > { %v6134_v19 = vpop.eup %6133  ;;  %5490 = vmatprep.mubr.msk.f32.mxu1 %vm1050_vm1, %v6132_v15 }
 0x38c   : > { %v1860_v50 = vpop.f32.mrf.mxu0  ;;  %5491 = vmatmul.mubr.msk.f32.gmra.mxu1 %vm1050_vm1, %v6134_v19 }
 0x38d   : > { %6147 = vtanh.f32 %v1860_v50 }
 0x38e   : > { %v6136_v22 = vpop.eup %6135  ;;  %6149 = vtanh.f32 %v5448_v16  ;;  %v5451_v24 = vpop.f32.mrf.mxu0 }
 0x38f   : > { %v6138_v27 = vpop.eup %6137  ;;  %5493 = vmatprep.mubr.msk.f32.mxu1 %vm1050_vm1, %v6136_v22 }
 0x390   : > { %v1870_v28 = vpop.f32.mrf.mxu0  ;;  %5494 = vmatmul.mubr.msk.f32.gmra.mxu1 %vm1050_vm1, %v6138_v27 }
 0x391   : > { %6151 = vtanh.f32 %v1870_v28 }
 0x392   : > { %v6140_v31 = vpop.eup %6139  ;;  %6153 = vtanh.f32 %v5451_v24  ;;  %v5454_v32 = vpop.f32.mrf.mxu0 }
 0x393   : > { %v6142_v35 = vpop.eup %6141  ;;  %5496 = vmatprep.mubr.msk.f32.mxu1 %vm1050_vm1, %v6140_v31 }
 0x394   : > { %v1880_v36 = vpop.f32.mrf.mxu0  ;;  %5497 = vmatmul.mubr.msk.f32.gmra.mxu1 %vm1050_vm1, %v6142_v35 }
 0x395   : > { %6155 = vtanh.f32 %v1880_v36 }
 0x396   : > { %v6144_v39 = vpop.eup %6143  ;;  %6157 = vtanh.f32 %v5454_v32 }
 0x397   : > { %v6146_v40 = vpop.eup %6145  ;;  %5499 = vmatprep.mubr.msk.f32.mxu1 %vm1050_vm1, %v6144_v39 }
 0x398   : > { %5500 = vmatmul.mubr.msk.f32.gmra.mxu1 %vm1050_vm1, %v6146_v40 }
 0x39a   : > { %v6148_v43 = vpop.eup %6147 }
 0x39b   : > { %v6150_v44 = vpop.eup %6149  ;;  %5502 = vmatprep.mubr.msk.f32.mxu1 %vm1050_vm1, %v6148_v43 }
 0x39c   : > { %5503 = vmatmul.mubr.msk.f32.gmra.mxu1 %vm1050_vm1, %v6150_v44 }
 0x39e   : > { %v6152_v59 = vpop.eup %6151 }
 0x39f   : > { %v6154_v60 = vpop.eup %6153  ;;  %5505 = vmatprep.mubr.msk.f32.mxu1 %vm1050_vm1, %v6152_v59 }
 0x3a0   : > { %5506 = vmatmul.mubr.msk.f32.gmra.mxu1 %vm1050_vm1, %v6154_v60 }
 0x3a2   : > { %v6156_v61 = vpop.eup %6155 }
 0x3a3   : > { %v6158_v62 = vpop.eup %6157  ;;  %5508 = vmatprep.mubr.msk.f32.mxu1 %vm1050_vm1, %v6156_v61 }
 0x3a4   : > { %5509 = vmatmul.mubr.msk.f32.gmra.mxu1 %vm1050_vm1, %v6158_v62 }
 0x428   : > { %v5465_v0 = vpop.f32.mrf.mxu1 }
 0x42a   : > { %v2088_v1 = vpop.f32.mrf.mxu1 }
 0x42c   : > { %v5468_v2 = vpop.f32.mrf.mxu1 }
 0x42e   : > { %v2098_v3 = vpop.f32.mrf.mxu1 }
 0x430   : > { %v5471_v4 = vpop.f32.mrf.mxu1 }
 0x432   : > { %v2108_v5 = vpop.f32.mrf.mxu1 }
 0x434   : > { %v5474_v6 = vpop.f32.mrf.mxu1 }
 0x435   : > { %5511 = vmatprep.subr.mxu0 %v5474_v6 }
 0x436   : > { %v2118_v7 = vpop.f32.mrf.mxu1  ;;  %5512 = vmatpush3.msra.mxu0 %v5474_v6 }
 0x437   : > { %5513 = vmatprep.subr.mxu0 %v2118_v7 }
 0x438   : > { %v5477_v8 = vpop.f32.mrf.mxu1  ;;  %5514 = vmatpush3.msra.mxu0 %v2118_v7 }
 0x439   : > { %5515 = vmatprep.subr.mxu0 %v5471_v4 }
 0x43a   : > { %v2128_v11 = vpop.f32.mrf.mxu1  ;;  %5516 = vmatpush3.msra.mxu0 %v5471_v4 }
 0x43b   : > { %5517 = vmatprep.subr.mxu0 %v2108_v5 }
 0x43c   : > { %v5480_v12 = vpop.f32.mrf.mxu1  ;;  %5518 = vmatpush3.msra.mxu0 %v2108_v5 }
 0x43d   : > { %5519 = vmatprep.subr.mxu0 %v5468_v2 }
 0x43e   : > { %v2138_v15 = vpop.f32.mrf.mxu1  ;;  %5520 = vmatpush3.msra.mxu0 %v5468_v2 }
 0x43f   : > { %5521 = vmatprep.subr.mxu0 %v2098_v3 }
 0x440   : > { %v5483_v16 = vpop.f32.mrf.mxu1  ;;  %5522 = vmatpush3.msra.mxu0 %v2098_v3 }
 0x441   : > { %5523 = vmatprep.subr.mxu0 %v5465_v0 }
 0x442   : > { %v2148_v19 = vpop.f32.mrf.mxu1  ;;  %5524 = vmatpush3.msra.mxu0 %v5465_v0 }
 0x443   : > { %5525 = vmatprep.subr.mxu0 %v2088_v1 }
 0x444   : > { %v5486_v50 = vpop.f32.mrf.mxu1  ;;  %5526 = vmatpush3.msra.mxu0 %v2088_v1 }
 0x445   : > { %5528 = vmatmul.mubr.msk.f32.vlgmr.msra.gmra.mxu0 %vm1372_vm2, %v6705_v9  ;;  %5539 = vmatprep.subr.mxu0 %v5486_v50 }
 0x446   : > { %v2158_v22 = vpop.f32.mrf.mxu1  ;;  %5540 = vmatpush3.msra.mxu0 %v5486_v50  ;;  %5530 = vmatprep.mubr.msk.f32.mxu0 %vm1372_vm2, %v6708_v10 }
 0x447   : > { %5541 = vmatprep.subr.mxu0 %v2158_v22 }
 0x448   : > { %v5489_v24 = vpop.f32.mrf.mxu1  ;;  %5542 = vmatpush3.msra.mxu0 %v2158_v22 }
 0x449   : > { %5531 = vmatmul.mubr.msk.f32.gmra.mxu0 %vm1372_vm2, %v6715_v13  ;;  %5543 = vmatprep.subr.mxu0 %v5483_v16 }
 0x44a   : > { %v2168_v27 = vpop.f32.mrf.mxu1  ;;  %5544 = vmatpush3.msra.mxu0 %v5483_v16  ;;  %5533 = vmatprep.mubr.msk.f32.mxu0 %vm1372_vm2, %v6718_v14 }
 0x44b   : > { %5545 = vmatprep.subr.mxu0 %v2148_v19 }
 0x44c   : > { %v5492_v9 = vpop.f32.mrf.mxu1  ;;  %5546 = vmatpush3.msra.mxu0 %v2148_v19 }
 0x44d   : > { %5534 = vmatmul.mubr.msk.f32.gmra.mxu0 %vm1372_vm2, %v6729_v17  ;;  %5547 = vmatprep.subr.mxu0 %v5480_v12 }
 0x44e   : > { %v2178_v10 = vpop.f32.mrf.mxu1  ;;  %5548 = vmatpush3.msra.mxu0 %v5480_v12  ;;  %5536 = vmatprep.mubr.msk.f32.mxu0 %vm1372_vm2, %v6732_v18 }
 0x44f   : > { %5549 = vmatprep.subr.mxu0 %v2138_v15 }
 0x450   : > { %v5495_v13 = vpop.f32.mrf.mxu1  ;;  %5550 = vmatpush3.msra.mxu0 %v2138_v15 }
 0x451   : > { %5537 = vmatmul.mubr.msk.f32.gmra.mxu0 %vm1372_vm2, %v6739_v20  ;;  %5551 = vmatprep.subr.mxu0 %v5477_v8 }
 0x452   : > { %v2188_v14 = vpop.f32.mrf.mxu1  ;;  %5552 = vmatpush3.msra.mxu0 %v5477_v8  ;;  %5555 = vmatprep.mubr.msk.f32.mxu0 %vm1372_vm2, %v6742_v21 }
 0x453   : > { %5553 = vmatprep.subr.mxu0 %v2128_v11 }
 0x454   : > { %v5498_v17 = vpop.f32.mrf.mxu1  ;;  %5554 = vmatpush3.msra.mxu0 %v2128_v11 }
 0x455   : > { %5556 = vmatmul.mubr.msk.f32.vlgmr.msra.gmra.mxu0 %vm1372_vm2, %v6749_v25  ;;  %5567 = vmatprep.subr.mxu0 %v5498_v17 }
 0x456   : > { %v2198_v18 = vpop.f32.mrf.mxu1  ;;  %5568 = vmatpush3.msra.mxu0 %v5498_v17  ;;  %5558 = vmatprep.mubr.msk.f32.mxu0 %vm1372_vm2, %v6752_v26 }
 0x457   : > { %5569 = vmatprep.subr.mxu0 %v2198_v18 }
 0x458   : > { %v5501_v20 = vpop.f32.mrf.mxu1  ;;  %5570 = vmatpush3.msra.mxu0 %v2198_v18 }
 0x459   : > { %5559 = vmatmul.mubr.msk.f32.gmra.mxu0 %vm1372_vm2, %v6759_v29  ;;  %5571 = vmatprep.subr.mxu0 %v5495_v13 }
 0x45a   : > { %v2208_v21 = vpop.f32.mrf.mxu1  ;;  %5572 = vmatpush3.msra.mxu0 %v5495_v13  ;;  %5561 = vmatprep.mubr.msk.f32.mxu0 %vm1372_vm2, %v6762_v30 }
 0x45b   : > { %5573 = vmatprep.subr.mxu0 %v2188_v14 }
 0x45c   : > { %v5504_v25 = vpop.f32.mrf.mxu1  ;;  %5574 = vmatpush3.msra.mxu0 %v2188_v14 }
 0x45d   : > { %5562 = vmatmul.mubr.msk.f32.gmra.mxu0 %vm1372_vm2, %v6769_v33  ;;  %5575 = vmatprep.subr.mxu0 %v5492_v9 }
 0x45e   : > { %v2218_v26 = vpop.f32.mrf.mxu1  ;;  %5576 = vmatpush3.msra.mxu0 %v5492_v9  ;;  %5564 = vmatprep.mubr.msk.f32.mxu0 %vm1372_vm2, %v6772_v34 }
 0x45f   : > { %5577 = vmatprep.subr.mxu0 %v2178_v10 }
 0x460   : > { %v5507_v29 = vpop.f32.mrf.mxu1  ;;  %5578 = vmatpush3.msra.mxu0 %v2178_v10 }
 0x461   : > { %5565 = vmatmul.mubr.msk.f32.gmra.mxu0 %vm1372_vm2, %v6779_v37  ;;  %5579 = vmatprep.subr.mxu0 %v5489_v24  ;;  %v4537_v37 = vld [vmem:[%s7334_s6 + $0x48] sm:$0xff] }
 0x462   : > { %v2228_v30 = vpop.f32.mrf.mxu1  ;;  %5580 = vmatpush3.msra.mxu0 %v5489_v24  ;;  %5583 = vmatprep.mubr.msk.f32.mxu0 %vm1372_vm2, %v6782_v38  ;;  %v4536_v38 = vld [vmem:[%s7334_s6 + $0x40] sm:$0xff] }
 0x463   : > { %5581 = vmatprep.subr.mxu0 %v2168_v27 }
 0x464   : > { %v5510_v33 = vpop.f32.mrf.mxu1  ;;  %5582 = vmatpush3.msra.mxu0 %v2168_v27 }
 0x465   : > { %5584 = vmatmul.mubr.msk.f32.vlgmr.msra.gmra.mxu0 %vm1372_vm2, %v6791_v41  ;;  %5595 = vmatprep.subr.mxu0 %v5510_v33 }
 0x466   : > { %v2238_v34 = vpop.f32.mrf.mxu1  ;;  %5596 = vmatpush3.msra.mxu0 %v5510_v33  ;;  %5586 = vmatprep.mubr.msk.f32.mxu0 %vm1372_vm2, %v6795_v42 }
 0x467   : > { %5597 = vmatprep.subr.mxu0 %v2238_v34 }
 0x468   : > { %5598 = vmatpush3.msra.mxu0 %v2238_v34 }
 0x469   : > { %5587 = vmatmul.mubr.msk.f32.gmra.mxu0 %vm1372_vm2, %v6803_v45  ;;  %5599 = vmatprep.subr.mxu0 %v5507_v29 }
 0x46a   : > { %5600 = vmatpush3.msra.mxu0 %v5507_v29  ;;  %5589 = vmatprep.mubr.msk.f32.mxu0 %vm1372_vm2, %v6806_v46 }
 0x46b   : > { %5601 = vmatprep.subr.mxu0 %v2228_v30 }
 0x46c   : > { %5602 = vmatpush3.msra.mxu0 %v2228_v30 }
 0x46d   : > { %5590 = vmatmul.mubr.msk.f32.gmra.mxu0 %vm1372_vm2, %v6813_v47  ;;  %5603 = vmatprep.subr.mxu0 %v5504_v25 }
 0x46e   : > { %5604 = vmatpush3.msra.mxu0 %v5504_v25  ;;  %5592 = vmatprep.mubr.msk.f32.mxu0 %vm1372_vm2, %v6816_v48 }
 0x46f   : > { %5605 = vmatprep.subr.mxu0 %v2218_v26 }
 0x470   : > { %5606 = vmatpush3.msra.mxu0 %v2218_v26 }
 0x471   : > { %5593 = vmatmul.mubr.msk.f32.gmra.mxu0 %vm1372_vm2, %v6823_v49  ;;  %5607 = vmatprep.subr.mxu0 %v5501_v20 }
 0x472   : > { %5608 = vmatpush3.msra.mxu0 %v5501_v20  ;;  %5611 = vmatprep.mubr.msk.f32.mxu0 %vm1372_vm2, %v6700_v58  ;;  %v4538_v58 = vld [vmem:[%s7334_s6 + $0x50] sm:$0xff] }
 0x473   : > { %5609 = vmatprep.subr.mxu0 %v2208_v21  ;;  %5625 = vmatprep.subr.mxu1 %v4538_v58 }
 0x474   : > { %5610 = vmatpush3.msra.mxu0 %v2208_v21  ;;  %5626 = vmatpush3.msra.mxu1 %v4538_v58 }
 0x475   : > { %5612 = vmatmul.mubr.msk.f32.vlgmr.msra.gmra.mxu0 %vm1372_vm2, %v6828_v51  ;;  %5627 = vmatprep.subr.mxu1 %v4537_v37 }
 0x476   : > { %5614 = vmatprep.mubr.msk.f32.mxu0 %vm1372_vm2, %v6831_v52  ;;  %5628 = vmatpush3.msra.mxu1 %v4537_v37 }
 0x477   : > { %5629 = vmatprep.subr.mxu1 %v4536_v38 }
 0x478   : > { %5630 = vmatpush3.msra.mxu1 %v4536_v38 }
 0x479   : > { %5615 = vmatmul.mubr.msk.f32.gmra.mxu0 %vm1372_vm2, %v6838_v53 }
 0x47a   : > { %5617 = vmatprep.mubr.msk.f32.mxu0 %vm1372_vm2, %v6841_v23 }
 0x47d   : > { %5618 = vmatmul.mubr.msk.f32.gmra.mxu0 %vm1372_vm2, %v6848_v54 }
 0x47e   : > { %5620 = vmatprep.mubr.msk.f32.mxu0 %vm1372_vm2, %v6851_v55 }
 0x481   : > { %5621 = vmatmul.mubr.msk.f32.gmra.mxu0 %vm1372_vm2, %v6858_v56 }
 0x482   : > { %5695 = vmatprep.mubr.msk.f32.mxu0 %vm1372_vm2, %v6695_v57 }
 0x505   : > { %v5529_v41 = vpop.f32.mrf.mxu0 }
 0x507   : > { %v2313_v57 = vpop.f32.mrf.mxu0 }
 0x508   : > { %6159 = vtanh.f32 %v2313_v57 }
 0x509   : > { %6161 = vtanh.f32 %v5529_v41  ;;  %v5532_v42 = vpop.f32.mrf.mxu0  ;;  %v3480_v41 = vld [vmem:[%s7335_s7 + $0x18] sm:$0xff] }
 0x50a   : > { %5791 = vmatprep.subr.mxu1 %v3480_v41 }
 0x50b   : > { %v2323_v45 = vpop.f32.mrf.mxu0 }
 0x50c   : > { %6163 = vtanh.f32 %v2323_v45 }
 0x50d   : > { %6165 = vtanh.f32 %v5532_v42  ;;  %v5535_v46 = vpop.f32.mrf.mxu0 }
 0x50f   : > { %v2333_v47 = vpop.f32.mrf.mxu0 }
 0x510   : > { %6167 = vtanh.f32 %v2333_v47 }
 0x511   : > { %6169 = vtanh.f32 %v5535_v46  ;;  %v5538_v48 = vpop.f32.mrf.mxu0 }
 0x513   : > { %v2343_v49 = vpop.f32.mrf.mxu0 }
 0x514   : > { %6171 = vtanh.f32 %v2343_v49 }
 0x515   : > { %v6160_v51 = vpop.eup %6159  ;;  %6173 = vtanh.f32 %v5538_v48  ;;  %v5557_v52 = vpop.f32.mrf.mxu0 }
 0x516   : > { %v6162_v53 = vpop.eup %6161  ;;  %5631 = vmatprep.mubr.msk.f32.mxu1 %vm1050_vm1, %v6160_v51 }
 0x517   : > { %v2418_v23 = vpop.f32.mrf.mxu0  ;;  %5632 = vmatmul.mubr.msk.f32.vlgmr.msra.gmra.mxu1 %vm1050_vm1, %v6162_v53 }
 0x518   : > { %6175 = vtanh.f32 %v2418_v23  ;;  %5792 = vmatpush3.msra.mxu1 %v3480_v41  ;;  %v6382_v41 = vld [vmem:[%s6692_s22] sm:$0xff] }
 0x519   : > { %v6164_v54 = vpop.eup %6163  ;;  %6177 = vtanh.f32 %v5557_v52  ;;  %v5560_v55 = vpop.f32.mrf.mxu0 }
 0x51a   : > { %v6166_v56 = vpop.eup %6165  ;;  %5634 = vmatprep.mubr.msk.f32.mxu1 %vm1050_vm1, %v6164_v54 }
 0x51b   : > { %v2428_v28 = vpop.f32.mrf.mxu0  ;;  %5635 = vmatmul.mubr.msk.f32.gmra.mxu1 %vm1050_vm1, %v6166_v56 }
 0x51c   : > { %6179 = vtanh.f32 %v2428_v28 }
 0x51d   : > { %v6168_v31 = vpop.eup %6167  ;;  %6181 = vtanh.f32 %v5560_v55  ;;  %v5563_v32 = vpop.f32.mrf.mxu0 }
 0x51e   : > { %v6170_v35 = vpop.eup %6169  ;;  %5637 = vmatprep.mubr.msk.f32.mxu1 %vm1050_vm1, %v6168_v31  ;;  %v7020_v31 = vld [vmem:[%s6692_s22 + $0x8] sm:$0xff] }
 0x51f   : > { %v2438_v36 = vpop.f32.mrf.mxu0  ;;  %5638 = vmatmul.mubr.msk.f32.gmra.mxu1 %vm1050_vm1, %v6170_v35  ;;  %v7025_v35 = vld [vmem:[%s6692_s22 + $0x10] sm:$0xff] }
 0x520   : > { %6183 = vtanh.f32 %v2438_v36 }
 0x521   : > { %v6172_v39 = vpop.eup %6171  ;;  %6185 = vtanh.f32 %v5563_v32  ;;  %v5566_v40 = vpop.f32.mrf.mxu0 }
 0x522   : > { %v6174_v43 = vpop.eup %6173  ;;  %5640 = vmatprep.mubr.msk.f32.mxu1 %vm1050_vm1, %v6172_v39  ;;  %v7032_v39 = vld [vmem:[%s6692_s22 + $0x18] sm:$0xff] }
 0x523   : > { %v2448_v44 = vpop.f32.mrf.mxu0  ;;  %5641 = vmatmul.mubr.msk.f32.gmra.mxu1 %vm1050_vm1, %v6174_v43  ;;  %v7039_v43 = vld [vmem:[%s6692_s22 + $0x20] sm:$0xff] }
 0x524   : > { %6187 = vtanh.f32 %v2448_v44 }
 0x525   : > { %v6176_v59 = vpop.eup %6175  ;;  %6189 = vtanh.f32 %v5566_v40  ;;  %v5585_v60 = vpop.f32.mrf.mxu0 }
 0x526   : > { %v6178_v61 = vpop.eup %6177  ;;  %5643 = vmatprep.mubr.msk.f32.mxu1 %vm1050_vm1, %v6176_v59  ;;  %v7044_v59 = vld [vmem:[%s6692_s22 + $0x28] sm:$0xff] }
 0x527   : > { %v2523_v62 = vpop.f32.mrf.mxu0  ;;  %5644 = vmatmul.mubr.msk.f32.gmra.mxu1 %vm1050_vm1, %v6178_v61  ;;  %v7049_v61 = vld [vmem:[%s6692_s22 + $0x30] sm:$0xff] }
 0x528   : > { %6191 = vtanh.f32 %v2523_v62 }
 0x529   : > { %v6180_v63 = vpop.eup %6179  ;;  %6193 = vtanh.f32 %v5585_v60  ;;  %v5588_v0 = vpop.f32.mrf.mxu0 }
 0x52a   : > { %v6182_v1 = vpop.eup %6181  ;;  %5646 = vmatprep.mubr.msk.f32.mxu1 %vm1050_vm1, %v6180_v63  ;;  %v7054_v63 = vld [vmem:[%s6692_s22 + $0x38] sm:$0xff] }
 0x52b   : > { %v2533_v2 = vpop.f32.mrf.mxu0  ;;  %5647 = vmatmul.mubr.msk.f32.gmra.mxu1 %vm1050_vm1, %v6182_v1  ;;  %v7059_v1 = vld [vmem:[%s6692_s22 + $0x40] sm:$0xff] }
 0x52c   : > { %6195 = vtanh.f32 %v2533_v2 }
 0x52d   : > { %v6184_v3 = vpop.eup %6183  ;;  %6197 = vtanh.f32 %v5588_v0  ;;  %v5591_v4 = vpop.f32.mrf.mxu0 }
 0x52e   : > { %v6186_v5 = vpop.eup %6185  ;;  %5649 = vmatprep.mubr.msk.f32.mxu1 %vm1050_vm1, %v6184_v3  ;;  %v7064_v3 = vld [vmem:[%s6692_s22 + $0x48] sm:$0xff] }
 0x52f   : > { %v2543_v6 = vpop.f32.mrf.mxu0  ;;  %5650 = vmatmul.mubr.msk.f32.gmra.mxu1 %vm1050_vm1, %v6186_v5  ;;  %v7069_v5 = vld [vmem:[%s6692_s22 + $0x50] sm:$0xff] }
 0x530   : > { %6199 = vtanh.f32 %v2543_v6 }
 0x531   : > { %v6188_v7 = vpop.eup %6187  ;;  %6201 = vtanh.f32 %v5591_v4  ;;  %v5594_v8 = vpop.f32.mrf.mxu0 }
 0x532   : > { %v6190_v11 = vpop.eup %6189  ;;  %5652 = vmatprep.mubr.msk.f32.mxu1 %vm1050_vm1, %v6188_v7  ;;  %v7074_v7 = vld [vmem:[%s6692_s22 + $0x58] sm:$0xff] }
 0x533   : > { %v2553_v12 = vpop.f32.mrf.mxu0  ;;  %5653 = vmatmul.mubr.msk.f32.gmra.mxu1 %vm1050_vm1, %v6190_v11  ;;  %v7079_v11 = vld [vmem:[%s6692_s22 + $0x60] sm:$0xff] }
 0x534   : > { %6203 = vtanh.f32 %v2553_v12 }
 0x535   : > { %v6192_v15 = vpop.eup %6191  ;;  %6205 = vtanh.f32 %v5594_v8  ;;  %v5613_v16 = vpop.f32.mrf.mxu0 }
 0x536   : > { %v6194_v19 = vpop.eup %6193  ;;  %5655 = vmatprep.mubr.msk.f32.mxu1 %vm1050_vm1, %v6192_v15  ;;  %v7084_v15 = vld [vmem:[%s6692_s22 + $0x68] sm:$0xff] }
 0x537   : > { %v2628_v50 = vpop.f32.mrf.mxu0  ;;  %5656 = vmatmul.mubr.msk.f32.gmra.mxu1 %vm1050_vm1, %v6194_v19  ;;  %v7089_v19 = vld [vmem:[%s6692_s22 + $0x70] sm:$0xff] }
 0x538   : > { %6207 = vtanh.f32 %v2628_v50 }
 0x539   : > { %v6196_v22 = vpop.eup %6195  ;;  %6209 = vtanh.f32 %v5613_v16  ;;  %v5616_v24 = vpop.f32.mrf.mxu0 }
 0x53a   : > { %v6198_v27 = vpop.eup %6197  ;;  %5658 = vmatprep.mubr.msk.f32.mxu1 %vm1050_vm1, %v6196_v22  ;;  %v7094_v22 = vld [vmem:[%s6692_s22 + $0x78] sm:$0xff] }
 0x53b   : > { %v2638_v9 = vpop.f32.mrf.mxu0  ;;  %5659 = vmatmul.mubr.msk.f32.gmra.mxu1 %vm1050_vm1, %v6198_v27  ;;  %v7101_v27 = vld [vmem:[%s6692_s22 + $0x80] sm:$0xff] }
 0x53c   : > { %6211 = vtanh.f32 %v2638_v9 }
 0x53d   : > { %v6200_v10 = vpop.eup %6199  ;;  %6213 = vtanh.f32 %v5616_v24  ;;  %v5619_v13 = vpop.f32.mrf.mxu0 }
 0x53e   : > { %v6202_v14 = vpop.eup %6201  ;;  %5661 = vmatprep.mubr.msk.f32.mxu1 %vm1050_vm1, %v6200_v10  ;;  %v7108_v10 = vld [vmem:[%s6692_s22 + $0x88] sm:$0xff] }
 0x53f   : > { %v2648_v17 = vpop.f32.mrf.mxu0  ;;  %5662 = vmatmul.mubr.msk.f32.gmra.mxu1 %vm1050_vm1, %v6202_v14  ;;  %v7113_v14 = vld [vmem:[%s6692_s22 + $0x90] sm:$0xff] }
 0x540   : > { %6215 = vtanh.f32 %v2648_v17  ;;  %v7118_v17 = vld [vmem:[%s6692_s22 + $0x98] sm:$0xff] }
 0x541   : > { %v6204_v18 = vpop.eup %6203  ;;  %6217 = vtanh.f32 %v5619_v13  ;;  %v5622_v20 = vpop.f32.mrf.mxu0 }
 0x542   : > { %v6206_v21 = vpop.eup %6205  ;;  %5664 = vmatprep.mubr.msk.f32.mxu1 %vm1050_vm1, %v6204_v18  ;;  %v7123_v18 = vld [vmem:[%s6692_s22 + $0xa0] sm:$0xff] }
 0x543   : > { %v2658_v25 = vpop.f32.mrf.mxu0  ;;  %5665 = vmatmul.mubr.msk.f32.gmra.mxu1 %vm1050_vm1, %v6206_v21  ;;  %v7133_v21 = vld [vmem:[%s6692_s22 + $0xb0] sm:$0xff] }
 0x544   : > { %6219 = vtanh.f32 %v2658_v25  ;;  %v7138_v25 = vld [vmem:[%s6692_s22 + $0xb8] sm:$0xff] }
 0x545   : > { %v6208_v26 = vpop.eup %6207  ;;  %6221 = vtanh.f32 %v5622_v20  ;;  %v7128_v20 = vld [vmem:[%s6692_s22 + $0xa8] sm:$0xff] }
 0x546   : > { %v6210_v29 = vpop.eup %6209  ;;  %5667 = vmatprep.mubr.msk.f32.mxu1 %vm1050_vm1, %v6208_v26  ;;  %v7143_v26 = vld [vmem:[%s6692_s22 + $0xc0] sm:$0xff] }
 0x547   : > { %5668 = vmatmul.mubr.msk.f32.gmra.mxu1 %vm1050_vm1, %v6210_v29  ;;  %v7148_v29 = vld [vmem:[%s6692_s22 + $0xc8] sm:$0xff] }
 0x549   : > { %v6212_v30 = vpop.eup %6211 }
 0x54a   : > { %v6214_v33 = vpop.eup %6213  ;;  %5670 = vmatprep.mubr.msk.f32.mxu1 %vm1050_vm1, %v6212_v30  ;;  %v7153_v30 = vld [vmem:[%s6692_s22 + $0xd0] sm:$0xff] }
 0x54b   : > { %5671 = vmatmul.mubr.msk.f32.gmra.mxu1 %vm1050_vm1, %v6214_v33  ;;  %v7158_v33 = vld [vmem:[%s6692_s22 + $0xd8] sm:$0xff] }
 0x54d   : > { %v6216_v34 = vpop.eup %6215 }
 0x54e   : > { %v6218_v58 = vpop.eup %6217  ;;  %5673 = vmatprep.mubr.msk.f32.mxu1 %vm1050_vm1, %v6216_v34  ;;  %v7163_v34 = vld [vmem:[%s6692_s22 + $0xe0] sm:$0xff] }
 0x54f   : > { %5674 = vmatmul.mubr.msk.f32.gmra.mxu1 %vm1050_vm1, %v6218_v58  ;;  %v7168_v58 = vld [vmem:[%s6692_s22 + $0xe8] sm:$0xff] }
 0x551   : > { %v6220_v37 = vpop.eup %6219 }
 0x552   : > { %v6222_v38 = vpop.eup %6221  ;;  %5676 = vmatprep.mubr.msk.f32.mxu1 %vm1050_vm1, %v6220_v37  ;;  %v7173_v37 = vld [vmem:[%s6692_s22 + $0xf0] sm:$0xff] }
 0x553   : > { %5677 = vmatmul.mubr.msk.f32.gmra.mxu1 %vm1050_vm1, %v6222_v38  ;;  %v7178_v38 = vld [vmem:[%s6692_s22 + $0xf8] sm:$0xff] }
 0x5d7   : > { %v5633_v57 = vpop.f32.mrf.mxu1 }
 0x5d9   : > { %v2866_v42 = vpop.f32.mrf.mxu1 }
 0x5db   : > { %v5636_v45 = vpop.f32.mrf.mxu1 }
 0x5dd   : > { %v2876_v46 = vpop.f32.mrf.mxu1 }
 0x5df   : > { %v5639_v47 = vpop.f32.mrf.mxu1 }
 0x5e1   : > { %v2886_v48 = vpop.f32.mrf.mxu1 }
 0x5e3   : > { %v5642_v49 = vpop.f32.mrf.mxu1 }
 0x5e4   : > { %5679 = vmatprep.subr.mxu0 %v5642_v49 }
 0x5e5   : > { %v2896_v51 = vpop.f32.mrf.mxu1  ;;  %5680 = vmatpush3.msra.mxu0 %v5642_v49 }
 0x5e6   : > { %5681 = vmatprep.subr.mxu0 %v2896_v51 }
 0x5e7   : > { %v5645_v52 = vpop.f32.mrf.mxu1  ;;  %5682 = vmatpush3.msra.mxu0 %v2896_v51 }
 0x5e8   : > { %5683 = vmatprep.subr.mxu0 %v5639_v47 }
 0x5e9   : > { %v2906_v53 = vpop.f32.mrf.mxu1  ;;  %5684 = vmatpush3.msra.mxu0 %v5639_v47 }
 0x5ea   : > { %5685 = vmatprep.subr.mxu0 %v2886_v48 }
 0x5eb   : > { %v5648_v23 = vpop.f32.mrf.mxu1  ;;  %5686 = vmatpush3.msra.mxu0 %v2886_v48 }
 0x5ec   : > { %5687 = vmatprep.subr.mxu0 %v5636_v45 }
 0x5ed   : > { %v2916_v54 = vpop.f32.mrf.mxu1  ;;  %5688 = vmatpush3.msra.mxu0 %v5636_v45  ;;  %v3477_v45 = vld [vmem:[%s7335_s7] sm:$0xff] }
 0x5ee   : > { %5689 = vmatprep.subr.mxu0 %v2876_v46 }
 0x5ef   : > { %v5651_v55 = vpop.f32.mrf.mxu1  ;;  %5690 = vmatpush3.msra.mxu0 %v2876_v46 }
 0x5f0   : > { %5691 = vmatprep.subr.mxu0 %v5633_v57 }
 0x5f1   : > { %v2926_v56 = vpop.f32.mrf.mxu1  ;;  %5692 = vmatpush3.msra.mxu0 %v5633_v57  ;;  %v3479_v57 = vld [vmem:[%s7335_s7 + $0x10] sm:$0xff] }
 0x5f2   : > { %5693 = vmatprep.subr.mxu0 %v2866_v42  ;;  %5793 = vmatprep.subr.mxu1 %v3479_v57 }
 0x5f3   : > { %v5654_v28 = vpop.f32.mrf.mxu1  ;;  %5694 = vmatpush3.msra.mxu0 %v2866_v42  ;;  %5794 = vmatpush3.msra.mxu1 %v3479_v57  ;;  %v3478_v42 = vld [vmem:[%s7335_s7 + $0x8] sm:$0xff] }
 0x5f4   : > { %5696 = vmatmul.mubr.msk.f32.vlgmr.msra.gmra.mxu0 %vm1372_vm2, %v7020_v31  ;;  %5707 = vmatprep.subr.mxu0 %v5654_v28 }
 0x5f5   : > { %v2936_v32 = vpop.f32.mrf.mxu1  ;;  %5708 = vmatpush3.msra.mxu0 %v5654_v28  ;;  %5698 = vmatprep.mubr.msk.f32.mxu0 %vm1372_vm2, %v7025_v35 }
 0x5f6   : > { %5709 = vmatprep.subr.mxu0 %v2936_v32  ;;  %5795 = vmatprep.subr.mxu1 %v3478_v42 }
 0x5f7   : > { %v7029_v36 = vpop.f32.mrf.mxu1  ;;  %5710 = vmatpush3.msra.mxu0 %v2936_v32  ;;  %5796 = vmatpush3.msra.mxu1 %v3478_v42 }
 0x5f8   : > { %5699 = vmatmul.mubr.msk.f32.gmra.mxu0 %vm1372_vm2, %v7032_v39  ;;  %5711 = vmatprep.subr.mxu0 %v5651_v55 }
 0x5f9   : > { %v7036_v40 = vpop.f32.mrf.mxu1  ;;  %5712 = vmatpush3.msra.mxu0 %v5651_v55  ;;  %5701 = vmatprep.mubr.msk.f32.mxu0 %vm1372_vm2, %v7039_v43 }
 0x5fa   : > { %5713 = vmatprep.subr.mxu0 %v2926_v56  ;;  %5797 = vmatprep.subr.mxu1 %v3477_v45 }
 0x5fb   : > { %v5660_v44 = vpop.f32.mrf.mxu1  ;;  %5714 = vmatpush3.msra.mxu0 %v2926_v56  ;;  %5798 = vmatpush3.msra.mxu1 %v3477_v45 }
 0x5fc   : > { %5702 = vmatmul.mubr.msk.f32.gmra.mxu0 %vm1372_vm2, %v7044_v59  ;;  %5715 = vmatprep.subr.mxu0 %v5648_v23 }
 0x5fd   : > { %v2956_v60 = vpop.f32.mrf.mxu1  ;;  %5716 = vmatpush3.msra.mxu0 %v5648_v23  ;;  %5704 = vmatprep.mubr.msk.f32.mxu0 %vm1372_vm2, %v7049_v61 }
 0x5fe   : > { %5717 = vmatprep.subr.mxu0 %v2916_v54 }
 0x5ff   : > { %v5663_v62 = vpop.f32.mrf.mxu1  ;;  %5718 = vmatpush3.msra.mxu0 %v2916_v54 }
 0x600   : > { %5705 = vmatmul.mubr.msk.f32.gmra.mxu0 %vm1372_vm2, %v7054_v63  ;;  %5719 = vmatprep.subr.mxu0 %v5645_v52 }
 0x601   : > { %v2966_v0 = vpop.f32.mrf.mxu1  ;;  %5720 = vmatpush3.msra.mxu0 %v5645_v52  ;;  %5723 = vmatprep.mubr.msk.f32.mxu0 %vm1372_vm2, %v7059_v1 }
 0x602   : > { %5721 = vmatprep.subr.mxu0 %v2906_v53 }
 0x603   : > { %v5666_v2 = vpop.f32.mrf.mxu1  ;;  %5722 = vmatpush3.msra.mxu0 %v2906_v53 }
 0x604   : > { %5724 = vmatmul.mubr.msk.f32.vlgmr.msra.gmra.mxu0 %vm1372_vm2, %v7064_v3  ;;  %5735 = vmatprep.subr.mxu0 %v5666_v2 }
 0x605   : > { %v2976_v4 = vpop.f32.mrf.mxu1  ;;  %5736 = vmatpush3.msra.mxu0 %v5666_v2  ;;  %5726 = vmatprep.mubr.msk.f32.mxu0 %vm1372_vm2, %v7069_v5 }
 0x606   : > { %5737 = vmatprep.subr.mxu0 %v2976_v4 }
 0x607   : > { %v5669_v6 = vpop.f32.mrf.mxu1  ;;  %5738 = vmatpush3.msra.mxu0 %v2976_v4 }
 0x608   : > { %5727 = vmatmul.mubr.msk.f32.gmra.mxu0 %vm1372_vm2, %v7074_v7  ;;  %5739 = vmatprep.subr.mxu0 %v5663_v62 }
 0x609   : > { %v2986_v8 = vpop.f32.mrf.mxu1  ;;  %5740 = vmatpush3.msra.mxu0 %v5663_v62  ;;  %5729 = vmatprep.mubr.msk.f32.mxu0 %vm1372_vm2, %v7079_v11 }
 0x60a   : > { %5741 = vmatprep.subr.mxu0 %v2966_v0 }
 0x60b   : > { %v5672_v12 = vpop.f32.mrf.mxu1  ;;  %5742 = vmatpush3.msra.mxu0 %v2966_v0 }
 0x60c   : > { %5730 = vmatmul.mubr.msk.f32.gmra.mxu0 %vm1372_vm2, %v7084_v15  ;;  %5743 = vmatprep.subr.mxu0 %v5660_v44 }
 0x60d   : > { %v2996_v16 = vpop.f32.mrf.mxu1  ;;  %5744 = vmatpush3.msra.mxu0 %v5660_v44  ;;  %5732 = vmatprep.mubr.msk.f32.mxu0 %vm1372_vm2, %v7089_v19 }
 0x60e   : > { %5745 = vmatprep.subr.mxu0 %v2956_v60 }
 0x60f   : > { %v5675_v50 = vpop.f32.mrf.mxu1  ;;  %5746 = vmatpush3.msra.mxu0 %v2956_v60 }
 0x610   : > { %5733 = vmatmul.mubr.msk.f32.gmra.mxu0 %vm1372_vm2, %v7094_v22  ;;  %5747 = vmatprep.subr.mxu0 %v7029_v36 }
 0x611   : > { %v3006_v24 = vpop.f32.mrf.mxu1  ;;  %5748 = vmatpush3.msra.mxu0 %v7029_v36  ;;  %5751 = vmatprep.mubr.msk.f32.mxu0 %vm1372_vm2, %v7101_v27 }
 0x612   : > { %5749 = vmatprep.subr.mxu0 %v7036_v40 }
 0x613   : > { %v5678_v9 = vpop.f32.mrf.mxu1  ;;  %5750 = vmatpush3.msra.mxu0 %v7036_v40 }
 0x614   : > { %5752 = vmatmul.mubr.msk.f32.vlgmr.msra.gmra.mxu0 %vm1372_vm2, %v7108_v10  ;;  %5763 = vmatprep.subr.mxu0 %v5678_v9 }
 0x615   : > { %v3016_v13 = vpop.f32.mrf.mxu1  ;;  %5764 = vmatpush3.msra.mxu0 %v5678_v9  ;;  %5754 = vmatprep.mubr.msk.f32.mxu0 %vm1372_vm2, %v7113_v14 }
 0x616   : > { %5765 = vmatprep.subr.mxu0 %v3016_v13 }
 0x617   : > { %5766 = vmatpush3.msra.mxu0 %v3016_v13 }
 0x618   : > { %5755 = vmatmul.mubr.msk.f32.gmra.mxu0 %vm1372_vm2, %v7118_v17  ;;  %5767 = vmatprep.subr.mxu0 %v5675_v50 }
 0x619   : > { %5768 = vmatpush3.msra.mxu0 %v5675_v50  ;;  %5757 = vmatprep.mubr.msk.f32.mxu0 %vm1372_vm2, %v7123_v18 }
 0x61a   : > { %5769 = vmatprep.subr.mxu0 %v3006_v24 }
 0x61b   : > { %5770 = vmatpush3.msra.mxu0 %v3006_v24 }
 0x61c   : > { %5758 = vmatmul.mubr.msk.f32.gmra.mxu0 %vm1372_vm2, %v7128_v20  ;;  %5771 = vmatprep.subr.mxu0 %v5672_v12 }
 0x61d   : > { %5772 = vmatpush3.msra.mxu0 %v5672_v12  ;;  %5760 = vmatprep.mubr.msk.f32.mxu0 %vm1372_vm2, %v7133_v21 }
 0x61e   : > { %5773 = vmatprep.subr.mxu0 %v2996_v16 }
 0x61f   : > { %5774 = vmatpush3.msra.mxu0 %v2996_v16 }
 0x620   : > { %5761 = vmatmul.mubr.msk.f32.gmra.mxu0 %vm1372_vm2, %v7138_v25  ;;  %5775 = vmatprep.subr.mxu0 %v5669_v6 }
 0x621   : > { %5776 = vmatpush3.msra.mxu0 %v5669_v6  ;;  %5779 = vmatprep.mubr.msk.f32.mxu0 %vm1372_vm2, %v7143_v26 }
 0x622   : > { %5777 = vmatprep.subr.mxu0 %v2986_v8 }
 0x623   : > { %5778 = vmatpush3.msra.mxu0 %v2986_v8 }
 0x624   : > { %5780 = vmatmul.mubr.msk.f32.vlgmr.msra.gmra.mxu0 %vm1372_vm2, %v7148_v29 }
 0x625   : > { %5782 = vmatprep.mubr.msk.f32.mxu0 %vm1372_vm2, %v7153_v30 }
 0x628   : > { %5783 = vmatmul.mubr.msk.f32.gmra.mxu0 %vm1372_vm2, %v7158_v33 }
 0x629   : > { %5785 = vmatprep.mubr.msk.f32.mxu0 %vm1372_vm2, %v7163_v34 }
 0x62c   : > { %5786 = vmatmul.mubr.msk.f32.gmra.mxu0 %vm1372_vm2, %v7168_v58 }
 0x62d   : > { %5788 = vmatprep.mubr.msk.f32.mxu0 %vm1372_vm2, %v7173_v37 }
 0x630   : > { %5789 = vmatmul.mubr.msk.f32.gmra.mxu0 %vm1372_vm2, %v7178_v38 }
 0x631   : > { %5863 = vmatprep.mubr.msk.f32.mxu0 %vm1372_vm2, %v6382_v41 }
 0x6b4   : > { %v5697_v46 = vpop.f32.mrf.mxu0 }
 0x6b6   : > { %v3091_v47 = vpop.f32.mrf.mxu0 }
 0x6b7   : > { %6223 = vtanh.f32 %v3091_v47 }
 0x6b8   : > { %6225 = vtanh.f32 %v5697_v46  ;;  %v5700_v48 = vpop.f32.mrf.mxu0 }
 0x6ba   : > { %v3101_v49 = vpop.f32.mrf.mxu0 }
 0x6bb   : > { %6227 = vtanh.f32 %v3101_v49 }
 0x6bc   : > { %6229 = vtanh.f32 %v5700_v48  ;;  %v5703_v51 = vpop.f32.mrf.mxu0 }
 0x6be   : > { %v3111_v52 = vpop.f32.mrf.mxu0 }
 0x6bf   : > { %6231 = vtanh.f32 %v3111_v52 }
 0x6c0   : > { %6233 = vtanh.f32 %v5703_v51  ;;  %v5706_v53 = vpop.f32.mrf.mxu0 }
 0x6c2   : > { %v3121_v23 = vpop.f32.mrf.mxu0 }
 0x6c3   : > { %6235 = vtanh.f32 %v3121_v23 }
 0x6c4   : > { %v6224_v54 = vpop.eup %6223  ;;  %6237 = vtanh.f32 %v5706_v53  ;;  %v5725_v55 = vpop.f32.mrf.mxu0 }
 0x6c5   : > { %v6226_v56 = vpop.eup %6225  ;;  %5799 = vmatprep.mubr.msk.f32.mxu1 %vm1050_vm1, %v6224_v54 }
 0x6c6   : > { %v3196_v28 = vpop.f32.mrf.mxu0  ;;  %5800 = vmatmul.mubr.msk.f32.vlgmr.msra.gmra.mxu1 %vm1050_vm1, %v6226_v56 }
 0x6c7   : > { %6239 = vtanh.f32 %v3196_v28 }
 0x6c8   : > { %v6228_v32 = vpop.eup %6227  ;;  %6241 = vtanh.f32 %v5725_v55  ;;  %v5728_v36 = vpop.f32.mrf.mxu0 }
 0x6c9   : > { %v6230_v40 = vpop.eup %6229  ;;  %5802 = vmatprep.mubr.msk.f32.mxu1 %vm1050_vm1, %v6228_v32 }
 0x6ca   : > { %v3206_v44 = vpop.f32.mrf.mxu0  ;;  %5803 = vmatmul.mubr.msk.f32.gmra.mxu1 %vm1050_vm1, %v6230_v40 }
 0x6cb   : > { %6243 = vtanh.f32 %v3206_v44 }
 0x6cc   : > { %v6232_v60 = vpop.eup %6231  ;;  %6245 = vtanh.f32 %v5728_v36  ;;  %v5731_v62 = vpop.f32.mrf.mxu0 }
 0x6cd   : > { %v6234_v0 = vpop.eup %6233  ;;  %5805 = vmatprep.mubr.msk.f32.mxu1 %vm1050_vm1, %v6232_v60 }
 0x6ce   : > { %v3216_v2 = vpop.f32.mrf.mxu0  ;;  %5806 = vmatmul.mubr.msk.f32.gmra.mxu1 %vm1050_vm1, %v6234_v0 }
 0x6cf   : > { %6247 = vtanh.f32 %v3216_v2 }
 0x6d0   : > { %v6236_v4 = vpop.eup %6235  ;;  %6249 = vtanh.f32 %v5731_v62  ;;  %v5734_v6 = vpop.f32.mrf.mxu0 }
 0x6d1   : > { %v6238_v8 = vpop.eup %6237  ;;  %5808 = vmatprep.mubr.msk.f32.mxu1 %vm1050_vm1, %v6236_v4 }
 0x6d2   : > { %v3226_v12 = vpop.f32.mrf.mxu0  ;;  %5809 = vmatmul.mubr.msk.f32.gmra.mxu1 %vm1050_vm1, %v6238_v8 }
 0x6d3   : > { %6251 = vtanh.f32 %v3226_v12 }
 0x6d4   : > { %v6240_v16 = vpop.eup %6239  ;;  %6253 = vtanh.f32 %v5734_v6  ;;  %v5753_v50 = vpop.f32.mrf.mxu0 }
 0x6d5   : > { %v6242_v24 = vpop.eup %6241  ;;  %5811 = vmatprep.mubr.msk.f32.mxu1 %vm1050_vm1, %v6240_v16 }
 0x6d6   : > { %v3301_v9 = vpop.f32.mrf.mxu0  ;;  %5812 = vmatmul.mubr.msk.f32.gmra.mxu1 %vm1050_vm1, %v6242_v24 }
 0x6d7   : > { %6255 = vtanh.f32 %v3301_v9 }
 0x6d8   : > { %v6244_v13 = vpop.eup %6243  ;;  %6257 = vtanh.f32 %v5753_v50  ;;  %v5756_v41 = vpop.f32.mrf.mxu0 }
 0x6d9   : > { %v6246_v57 = vpop.eup %6245  ;;  %5814 = vmatprep.mubr.msk.f32.mxu1 %vm1050_vm1, %v6244_v13 }
 0x6da   : > { %v3311_v42 = vpop.f32.mrf.mxu0  ;;  %5815 = vmatmul.mubr.msk.f32.gmra.mxu1 %vm1050_vm1, %v6246_v57 }
 0x6db   : > { %6259 = vtanh.f32 %v3311_v42 }
 0x6dc   : > { %v6248_v45 = vpop.eup %6247  ;;  %6261 = vtanh.f32 %v5756_v41  ;;  %v5759_v46 = vpop.f32.mrf.mxu0 }
 0x6dd   : > { %v6250_v47 = vpop.eup %6249  ;;  %5817 = vmatprep.mubr.msk.f32.mxu1 %vm1050_vm1, %v6248_v45 }
 0x6de   : > { %v3321_v48 = vpop.f32.mrf.mxu0  ;;  %5818 = vmatmul.mubr.msk.f32.gmra.mxu1 %vm1050_vm1, %v6250_v47 }
 0x6df   : > { %6263 = vtanh.f32 %v3321_v48 }
 0x6e0   : > { %v6252_v49 = vpop.eup %6251  ;;  %6265 = vtanh.f32 %v5759_v46  ;;  %v5762_v51 = vpop.f32.mrf.mxu0 }
 0x6e1   : > { %v6254_v52 = vpop.eup %6253  ;;  %5820 = vmatprep.mubr.msk.f32.mxu1 %vm1050_vm1, %v6252_v49 }
 0x6e2   : > { %v3331_v53 = vpop.f32.mrf.mxu0  ;;  %5821 = vmatmul.mubr.msk.f32.gmra.mxu1 %vm1050_vm1, %v6254_v52 }
 0x6e3   : > { %6267 = vtanh.f32 %v3331_v53 }
 0x6e4   : > { %v6256_v23 = vpop.eup %6255  ;;  %6269 = vtanh.f32 %v5762_v51  ;;  %v5781_v54 = vpop.f32.mrf.mxu0 }
 0x6e5   : > { %v6258_v55 = vpop.eup %6257  ;;  %5823 = vmatprep.mubr.msk.f32.mxu1 %vm1050_vm1, %v6256_v23 }
 0x6e6   : > { %v3406_v56 = vpop.f32.mrf.mxu0  ;;  %5824 = vmatmul.mubr.msk.f32.gmra.mxu1 %vm1050_vm1, %v6258_v55 }
 0x6e7   : > { %6271 = vtanh.f32 %v3406_v56 }
 0x6e8   : > { %v6260_v28 = vpop.eup %6259  ;;  %6273 = vtanh.f32 %v5781_v54  ;;  %v5784_v32 = vpop.f32.mrf.mxu0 }
 0x6e9   : > { %v6262_v36 = vpop.eup %6261  ;;  %5826 = vmatprep.mubr.msk.f32.mxu1 %vm1050_vm1, %v6260_v28 }
 0x6ea   : > { %v3416_v40 = vpop.f32.mrf.mxu0  ;;  %5827 = vmatmul.mubr.msk.f32.gmra.mxu1 %vm1050_vm1, %v6262_v36 }
 0x6eb   : > { %6275 = vtanh.f32 %v3416_v40 }
 0x6ec   : > { %v6264_v44 = vpop.eup %6263  ;;  %6277 = vtanh.f32 %v5784_v32  ;;  %v5787_v60 = vpop.f32.mrf.mxu0 }
 0x6ed   : > { %v6266_v62 = vpop.eup %6265  ;;  %5829 = vmatprep.mubr.msk.f32.mxu1 %vm1050_vm1, %v6264_v44 }
 0x6ee   : > { %v3426_v0 = vpop.f32.mrf.mxu0  ;;  %5830 = vmatmul.mubr.msk.f32.gmra.mxu1 %vm1050_vm1, %v6266_v62 }
 0x6ef   : > { %6279 = vtanh.f32 %v3426_v0 }
 0x6f0   : > { %v6268_v2 = vpop.eup %6267  ;;  %6281 = vtanh.f32 %v5787_v60  ;;  %v5790_v4 = vpop.f32.mrf.mxu0 }
 0x6f1   : > { %v6270_v6 = vpop.eup %6269  ;;  %5832 = vmatprep.mubr.msk.f32.mxu1 %vm1050_vm1, %v6268_v2 }
 0x6f2   : > { %v3436_v8 = vpop.f32.mrf.mxu0  ;;  %5833 = vmatmul.mubr.msk.f32.gmra.mxu1 %vm1050_vm1, %v6270_v6 }
 0x6f3   : > { %6283 = vtanh.f32 %v3436_v8 }
 0x6f4   : > { %v6272_v12 = vpop.eup %6271  ;;  %6285 = vtanh.f32 %v5790_v4 }
 0x6f5   : > { %v6274_v16 = vpop.eup %6273  ;;  %5835 = vmatprep.mubr.msk.f32.mxu1 %vm1050_vm1, %v6272_v12 }
 0x6f6   : > { %5836 = vmatmul.mubr.msk.f32.gmra.mxu1 %vm1050_vm1, %v6274_v16 }
 0x6f8   : > { %v6276_v50 = vpop.eup %6275 }
 0x6f9   : > { %v6278_v24 = vpop.eup %6277  ;;  %5838 = vmatprep.mubr.msk.f32.mxu1 %vm1050_vm1, %v6276_v50 }
 0x6fa   : > { %5839 = vmatmul.mubr.msk.f32.gmra.mxu1 %vm1050_vm1, %v6278_v24 }
 0x6fc   : > { %v6280_v9 = vpop.eup %6279 }
 0x6fd   : > { %v6282_v13 = vpop.eup %6281  ;;  %5841 = vmatprep.mubr.msk.f32.mxu1 %vm1050_vm1, %v6280_v9 }
 0x6fe   : > { %5842 = vmatmul.mubr.msk.f32.gmra.mxu1 %vm1050_vm1, %v6282_v13 }
 0x700   : > { %v6284_v41 = vpop.eup %6283 }
 0x701   : > { %v6286_v57 = vpop.eup %6285  ;;  %5844 = vmatprep.mubr.msk.f32.mxu1 %vm1050_vm1, %v6284_v41 }
 0x702   : > { %5845 = vmatmul.mubr.msk.f32.gmra.mxu1 %vm1050_vm1, %v6286_v57 }
 0x786   : > { %v5801_v42 = vpop.f32.mrf.mxu1 }
 0x788   : > { %v3643_v45 = vpop.f32.mrf.mxu1 }
 0x78a   : > { %v5804_v46 = vpop.f32.mrf.mxu1 }
 0x78c   : > { %v3653_v47 = vpop.f32.mrf.mxu1 }
 0x78e   : > { %v5807_v48 = vpop.f32.mrf.mxu1 }
 0x790   : > { %v3663_v49 = vpop.f32.mrf.mxu1 }
 0x792   : > { %v5810_v51 = vpop.f32.mrf.mxu1 }
 0x793   : > { %5847 = vmatprep.subr.mxu0 %v5810_v51 }
 0x794   : > { %v3673_v52 = vpop.f32.mrf.mxu1  ;;  %5848 = vmatpush3.msra.mxu0 %v5810_v51 }
 0x795   : > { %5849 = vmatprep.subr.mxu0 %v3673_v52 }
 0x796   : > { %v5813_v53 = vpop.f32.mrf.mxu1  ;;  %5850 = vmatpush3.msra.mxu0 %v3673_v52 }
 0x797   : > { %5851 = vmatprep.subr.mxu0 %v5807_v48 }
 0x798   : > { %v3683_v23 = vpop.f32.mrf.mxu1  ;;  %5852 = vmatpush3.msra.mxu0 %v5807_v48 }
 0x799   : > { %5853 = vmatprep.subr.mxu0 %v3663_v49 }
 0x79a   : > { %v5816_v54 = vpop.f32.mrf.mxu1  ;;  %5854 = vmatpush3.msra.mxu0 %v3663_v49 }
 0x79b   : > { %5855 = vmatprep.subr.mxu0 %v5804_v46 }
 0x79c   : > { %v3693_v55 = vpop.f32.mrf.mxu1  ;;  %5856 = vmatpush3.msra.mxu0 %v5804_v46 }
 0x79d   : > { %5857 = vmatprep.subr.mxu0 %v3653_v47 }
 0x79e   : > { %v5819_v56 = vpop.f32.mrf.mxu1  ;;  %5858 = vmatpush3.msra.mxu0 %v3653_v47 }
 0x79f   : > { %5859 = vmatprep.subr.mxu0 %v5801_v42 }
 0x7a0   : > { %v3703_v28 = vpop.f32.mrf.mxu1  ;;  %5860 = vmatpush3.msra.mxu0 %v5801_v42 }
 0x7a1   : > { %5861 = vmatprep.subr.mxu0 %v3643_v45 }
 0x7a2   : > { %v5822_v32 = vpop.f32.mrf.mxu1  ;;  %5862 = vmatpush3.msra.mxu0 %v3643_v45 }
 0x7a3   : > { %5875 = vmatprep.subr.mxu0 %v5822_v32  ;;  %5864 = vmatmul.mubr.msk.f32.vlgmr.msra.gmra.mxu0 %vm1372_vm2, %v7020_v31 }
 0x7a4   : > { %v3713_v36 = vpop.f32.mrf.mxu1  ;;  %5876 = vmatpush3.msra.mxu0 %v5822_v32  ;;  %5866 = vmatprep.mubr.msk.f32.mxu0 %vm1372_vm2, %v7025_v35 }
 0x7a5   : > { %5877 = vmatprep.subr.mxu0 %v3713_v36 }
 0x7a6   : > { %v5825_v40 = vpop.f32.mrf.mxu1  ;;  %5878 = vmatpush3.msra.mxu0 %v3713_v36 }
 0x7a7   : > { %5879 = vmatprep.subr.mxu0 %v5819_v56  ;;  %5867 = vmatmul.mubr.msk.f32.gmra.mxu0 %vm1372_vm2, %v7032_v39 }
 0x7a8   : > { %v3723_v44 = vpop.f32.mrf.mxu1  ;;  %5880 = vmatpush3.msra.mxu0 %v5819_v56  ;;  %5869 = vmatprep.mubr.msk.f32.mxu0 %vm1372_vm2, %v7039_v43 }
 0x7a9   : > { %5881 = vmatprep.subr.mxu0 %v3703_v28 }
 0x7aa   : > { %v5828_v60 = vpop.f32.mrf.mxu1  ;;  %5882 = vmatpush3.msra.mxu0 %v3703_v28 }
 0x7ab   : > { %5883 = vmatprep.subr.mxu0 %v5816_v54  ;;  %5870 = vmatmul.mubr.msk.f32.gmra.mxu0 %vm1372_vm2, %v7044_v59 }
 0x7ac   : > { %v3733_v31 = vpop.f32.mrf.mxu1  ;;  %5884 = vmatpush3.msra.mxu0 %v5816_v54  ;;  %5872 = vmatprep.mubr.msk.f32.mxu0 %vm1372_vm2, %v7049_v61 }
 0x7ad   : > { %5885 = vmatprep.subr.mxu0 %v3693_v55 }
 0x7ae   : > { %v5831_v35 = vpop.f32.mrf.mxu1  ;;  %5886 = vmatpush3.msra.mxu0 %v3693_v55 }
 0x7af   : > { %5887 = vmatprep.subr.mxu0 %v5813_v53  ;;  %5873 = vmatmul.mubr.msk.f32.gmra.mxu0 %vm1372_vm2, %v7054_v63 }
 0x7b0   : > { %v3743_v39 = vpop.f32.mrf.mxu1  ;;  %5888 = vmatpush3.msra.mxu0 %v5813_v53  ;;  %5891 = vmatprep.mubr.msk.f32.mxu0 %vm1372_vm2, %v7059_v1 }
 0x7b1   : > { %5889 = vmatprep.subr.mxu0 %v3683_v23 }
 0x7b2   : > { %v5834_v43 = vpop.f32.mrf.mxu1  ;;  %5890 = vmatpush3.msra.mxu0 %v3683_v23 }
 0x7b3   : > { %5903 = vmatprep.subr.mxu0 %v5834_v43  ;;  %5892 = vmatmul.mubr.msk.f32.vlgmr.msra.gmra.mxu0 %vm1372_vm2, %v7064_v3 }
 0x7b4   : > { %v3753_v59 = vpop.f32.mrf.mxu1  ;;  %5904 = vmatpush3.msra.mxu0 %v5834_v43  ;;  %5894 = vmatprep.mubr.msk.f32.mxu0 %vm1372_vm2, %v7069_v5 }
 0x7b5   : > { %5905 = vmatprep.subr.mxu0 %v3753_v59 }
 0x7b6   : > { %v5837_v61 = vpop.f32.mrf.mxu1  ;;  %5906 = vmatpush3.msra.mxu0 %v3753_v59 }
 0x7b7   : > { %5907 = vmatprep.subr.mxu0 %v5831_v35  ;;  %5895 = vmatmul.mubr.msk.f32.gmra.mxu0 %vm1372_vm2, %v7074_v7 }
 0x7b8   : > { %v3763_v63 = vpop.f32.mrf.mxu1  ;;  %5908 = vmatpush3.msra.mxu0 %v5831_v35  ;;  %5897 = vmatprep.mubr.msk.f32.mxu0 %vm1372_vm2, %v7079_v11 }
 0x7b9   : > { %5909 = vmatprep.subr.mxu0 %v3743_v39 }
 0x7ba   : > { %v5840_v1 = vpop.f32.mrf.mxu1  ;;  %5910 = vmatpush3.msra.mxu0 %v3743_v39 }
 0x7bb   : > { %5911 = vmatprep.subr.mxu0 %v5828_v60  ;;  %5898 = vmatmul.mubr.msk.f32.gmra.mxu0 %vm1372_vm2, %v7084_v15 }
 0x7bc   : > { %v3773_v3 = vpop.f32.mrf.mxu1  ;;  %5912 = vmatpush3.msra.mxu0 %v5828_v60  ;;  %5900 = vmatprep.mubr.msk.f32.mxu0 %vm1372_vm2, %v7089_v19 }
 0x7bd   : > { %5913 = vmatprep.subr.mxu0 %v3733_v31 }
 0x7be   : > { %v5843_v5 = vpop.f32.mrf.mxu1  ;;  %5914 = vmatpush3.msra.mxu0 %v3733_v31 }
 0x7bf   : > { %5915 = vmatprep.subr.mxu0 %v5825_v40  ;;  %5901 = vmatmul.mubr.msk.f32.gmra.mxu0 %vm1372_vm2, %v7094_v22 }
 0x7c0   : > { %v3783_v7 = vpop.f32.mrf.mxu1  ;;  %5916 = vmatpush3.msra.mxu0 %v5825_v40  ;;  %5919 = vmatprep.mubr.msk.f32.mxu0 %vm1372_vm2, %v7101_v27 }
 0x7c1   : > { %5917 = vmatprep.subr.mxu0 %v3723_v44 }
 0x7c2   : > { %v5846_v11 = vpop.f32.mrf.mxu1  ;;  %5918 = vmatpush3.msra.mxu0 %v3723_v44 }
 0x7c3   : > { %5931 = vmatprep.subr.mxu0 %v5846_v11  ;;  %5920 = vmatmul.mubr.msk.f32.vlgmr.msra.gmra.mxu0 %vm1372_vm2, %v7108_v10 }
 0x7c4   : > { %v3793_v15 = vpop.f32.mrf.mxu1  ;;  %5932 = vmatpush3.msra.mxu0 %v5846_v11  ;;  %5922 = vmatprep.mubr.msk.f32.mxu0 %vm1372_vm2, %v7113_v14 }
 0x7c5   : > { %5933 = vmatprep.subr.mxu0 %v3793_v15 }
 0x7c6   : > { %5934 = vmatpush3.msra.mxu0 %v3793_v15 }
 0x7c7   : > { %5935 = vmatprep.subr.mxu0 %v5843_v5  ;;  %5923 = vmatmul.mubr.msk.f32.gmra.mxu0 %vm1372_vm2, %v7118_v17 }
 0x7c8   : > { %5936 = vmatpush3.msra.mxu0 %v5843_v5  ;;  %5925 = vmatprep.mubr.msk.f32.mxu0 %vm1372_vm2, %v7123_v18 }
 0x7c9   : > { %5937 = vmatprep.subr.mxu0 %v3783_v7 }
 0x7ca   : > { %5938 = vmatpush3.msra.mxu0 %v3783_v7 }
 0x7cb   : > { %5939 = vmatprep.subr.mxu0 %v5840_v1  ;;  %5926 = vmatmul.mubr.msk.f32.gmra.mxu0 %vm1372_vm2, %v7128_v20 }
 0x7cc   : > { %5940 = vmatpush3.msra.mxu0 %v5840_v1  ;;  %5928 = vmatprep.mubr.msk.f32.mxu0 %vm1372_vm2, %v7133_v21 }
 0x7cd   : > { %5941 = vmatprep.subr.mxu0 %v3773_v3 }
 0x7ce   : > { %5942 = vmatpush3.msra.mxu0 %v3773_v3 }
 0x7cf   : > { %5943 = vmatprep.subr.mxu0 %v5837_v61  ;;  %5929 = vmatmul.mubr.msk.f32.gmra.mxu0 %vm1372_vm2, %v7138_v25 }
 0x7d0   : > { %5944 = vmatpush3.msra.mxu0 %v5837_v61  ;;  %5947 = vmatprep.mubr.msk.f32.mxu0 %vm1372_vm2, %v7143_v26 }
 0x7d1   : > { %5945 = vmatprep.subr.mxu0 %v3763_v63 }
 0x7d2   : > { %5946 = vmatpush3.msra.mxu0 %v3763_v63 }
 0x7d3   : > { %5948 = vmatmul.mubr.msk.f32.vlgmr.msra.gmra.mxu0 %vm1372_vm2, %v7148_v29 }
 0x7d4   : > { %5950 = vmatprep.mubr.msk.f32.mxu0 %vm1372_vm2, %v7153_v30 }
 0x7d7   : > { %5951 = vmatmul.mubr.msk.f32.gmra.mxu0 %vm1372_vm2, %v7158_v33 }
 0x7d8   : > { %5953 = vmatprep.mubr.msk.f32.mxu0 %vm1372_vm2, %v7163_v34 }
 0x7db   : > { %5954 = vmatmul.mubr.msk.f32.gmra.mxu0 %vm1372_vm2, %v7168_v58 }
 0x7dc   : > { %5956 = vmatprep.mubr.msk.f32.mxu0 %vm1372_vm2, %v7173_v37 }
 0x7df   : > { %5957 = vmatmul.mubr.msk.f32.gmra.mxu0 %vm1372_vm2, %v7178_v38 }
 0x863   : > { %v5865_v19 = vpop.f32.mrf.mxu0 }
 0x864   : > { %6287 = vtanh.f32 %v5865_v19 }
 0x865   : > { %v3868_v22 = vpop.f32.mrf.mxu0 }
 0x866   : > { %6289 = vtanh.f32 %v3868_v22 }
 0x867   : > { %v5868_v27 = vpop.f32.mrf.mxu0 }
 0x868   : > { %6291 = vtanh.f32 %v5868_v27 }
 0x869   : > { %v3878_v10 = vpop.f32.mrf.mxu0 }
 0x86a   : > { %6293 = vtanh.f32 %v3878_v10 }
 0x86b   : > { %v5871_v14 = vpop.f32.mrf.mxu0 }
 0x86c   : > { %6295 = vtanh.f32 %v5871_v14 }
 0x86d   : > { %v3888_v17 = vpop.f32.mrf.mxu0 }
 0x86e   : > { %6297 = vtanh.f32 %v3888_v17 }
 0x86f   : > { %v5874_v18 = vpop.f32.mrf.mxu0 }
 0x870   : > { %6299 = vtanh.f32 %v5874_v18 }
 0x871   : > { %v6288_v20 = vpop.eup %6287  ;;  %v3898_v21 = vpop.f32.mrf.mxu0 }
 0x872   : > { %4255 = vst [vmem:[%s7291_s30 + $0x8] sm:$0xff] %v6288_v20  ;;  %6301 = vtanh.f32 %v3898_v21 }
 0x873   : > { %v6290_v25 = vpop.eup %6289  ;;  %v5893_v26 = vpop.f32.mrf.mxu0 }
 0x874   : > { %4254 = vst [vmem:[%s7291_s30] sm:$0xff] %v6290_v25  ;;  %6303 = vtanh.f32 %v5893_v26 }
 0x875   : > { %v6292_v29 = vpop.eup %6291  ;;  %v3973_v30 = vpop.f32.mrf.mxu0 }
 0x876   : > { %4257 = vst [vmem:[%s7291_s30 + $0x18] sm:$0xff] %v6292_v29  ;;  %6305 = vtanh.f32 %v3973_v30 }
 0x877   : > { %v6294_v33 = vpop.eup %6293  ;;  %v5896_v34 = vpop.f32.mrf.mxu0 }
 0x878   : > { %4256 = vst [vmem:[%s7291_s30 + $0x10] sm:$0xff] %v6294_v33  ;;  %6307 = vtanh.f32 %v5896_v34 }
 0x879   : > { %v6296_v58 = vpop.eup %6295  ;;  %v3983_v37 = vpop.f32.mrf.mxu0 }
 0x87a   : > { %4259 = vst [vmem:[%s7291_s30 + $0x28] sm:$0xff] %v6296_v58  ;;  %6309 = vtanh.f32 %v3983_v37 }
 0x87b   : > { %v6298_v38 = vpop.eup %6297  ;;  %v5899_v62 = vpop.f32.mrf.mxu0 }
 0x87c   : > { %4258 = vst [vmem:[%s7291_s30 + $0x20] sm:$0xff] %v6298_v38  ;;  %6311 = vtanh.f32 %v5899_v62 }
 0x87d   : > { %v6300_v0 = vpop.eup %6299  ;;  %v3993_v2 = vpop.f32.mrf.mxu0 }
 0x87e   : > { %4261 = vst [vmem:[%s7291_s30 + $0x38] sm:$0xff] %v6300_v0  ;;  %6313 = vtanh.f32 %v3993_v2 }
 0x87f   : > { %v6302_v4 = vpop.eup %6301  ;;  %v5902_v6 = vpop.f32.mrf.mxu0 }
 0x880   : > { %4260 = vst [vmem:[%s7291_s30 + $0x30] sm:$0xff] %v6302_v4  ;;  %6315 = vtanh.f32 %v5902_v6 }
 0x881   : > { %v6304_v8 = vpop.eup %6303  ;;  %v4003_v12 = vpop.f32.mrf.mxu0 }
 0x882   : > { %4263 = vst [vmem:[%s7291_s30 + $0x48] sm:$0xff] %v6304_v8  ;;  %6317 = vtanh.f32 %v4003_v12 }
 0x883   : > { %v6306_v16 = vpop.eup %6305  ;;  %v5921_v50 = vpop.f32.mrf.mxu0 }
 0x884   : > { %4262 = vst [vmem:[%s7291_s30 + $0x40] sm:$0xff] %v6306_v16  ;;  %6319 = vtanh.f32 %v5921_v50 }
 0x885   : > { %v6308_v24 = vpop.eup %6307  ;;  %v4078_v9 = vpop.f32.mrf.mxu0 }
 0x886   : > { %4265 = vst [vmem:[%s7291_s30 + $0x58] sm:$0xff] %v6308_v24  ;;  %6321 = vtanh.f32 %v4078_v9 }
 0x887   : > { %v6310_v13 = vpop.eup %6309  ;;  %v5924_v41 = vpop.f32.mrf.mxu0 }
 0x888   : > { %4264 = vst [vmem:[%s7291_s30 + $0x50] sm:$0xff] %v6310_v13  ;;  %6323 = vtanh.f32 %v5924_v41 }
 0x889   : > { %v6312_v57 = vpop.eup %6311  ;;  %v4088_v42 = vpop.f32.mrf.mxu0 }
 0x88a   : > { %4267 = vst [vmem:[%s7291_s30 + $0x68] sm:$0xff] %v6312_v57  ;;  %6325 = vtanh.f32 %v4088_v42 }
 0x88b   : > { %v6314_v45 = vpop.eup %6313  ;;  %v5927_v46 = vpop.f32.mrf.mxu0 }
 0x88c   : > { %4266 = vst [vmem:[%s7291_s30 + $0x60] sm:$0xff] %v6314_v45  ;;  %6327 = vtanh.f32 %v5927_v46 }
 0x88d   : > { %v6316_v47 = vpop.eup %6315  ;;  %v4098_v48 = vpop.f32.mrf.mxu0 }
 0x88e   : > { %4269 = vst [vmem:[%s7291_s30 + $0x78] sm:$0xff] %v6316_v47  ;;  %6329 = vtanh.f32 %v4098_v48 }
 0x88f   : > { %v6318_v49 = vpop.eup %6317  ;;  %v5930_v51 = vpop.f32.mrf.mxu0 }
 0x890   : > { %4268 = vst [vmem:[%s7291_s30 + $0x70] sm:$0xff] %v6318_v49  ;;  %6331 = vtanh.f32 %v5930_v51 }
 0x891   : > { %v6320_v52 = vpop.eup %6319  ;;  %v4108_v53 = vpop.f32.mrf.mxu0 }
 0x892   : > { %4271 = vst [vmem:[%s7291_s30 + $0x88] sm:$0xff] %v6320_v52  ;;  %6333 = vtanh.f32 %v4108_v53 }
 0x893   : > { %v6322_v23 = vpop.eup %6321  ;;  %v5949_v54 = vpop.f32.mrf.mxu0 }
 0x894   : > { %4270 = vst [vmem:[%s7291_s30 + $0x80] sm:$0xff] %v6322_v23  ;;  %6335 = vtanh.f32 %v5949_v54 }
 0x895   : > { %v6324_v55 = vpop.eup %6323  ;;  %v4183_v56 = vpop.f32.mrf.mxu0 }
 0x896   : > { %4273 = vst [vmem:[%s7291_s30 + $0x98] sm:$0xff] %v6324_v55  ;;  %6337 = vtanh.f32 %v4183_v56 }
 0x897   : > { %v6326_v28 = vpop.eup %6325  ;;  %v5952_v32 = vpop.f32.mrf.mxu0 }
 0x898   : > { %4272 = vst [vmem:[%s7291_s30 + $0x90] sm:$0xff] %v6326_v28  ;;  %6339 = vtanh.f32 %v5952_v32 }
 0x899   : > { %v6328_v36 = vpop.eup %6327  ;;  %v4193_v40 = vpop.f32.mrf.mxu0 }
 0x89a   : > { %4275 = vst [vmem:[%s7291_s30 + $0xa8] sm:$0xff] %v6328_v36  ;;  %6341 = vtanh.f32 %v4193_v40 }
 0x89b   : > { %v6330_v44 = vpop.eup %6329  ;;  %v5955_v60 = vpop.f32.mrf.mxu0 }
 0x89c   : > { %4274 = vst [vmem:[%s7291_s30 + $0xa0] sm:$0xff] %v6330_v44  ;;  %6343 = vtanh.f32 %v5955_v60 }
 0x89d   : > { %v6332_v31 = vpop.eup %6331  ;;  %v4203_v35 = vpop.f32.mrf.mxu0 }
 0x89e   : > { %4277 = vst [vmem:[%s7291_s30 + $0xb8] sm:$0xff] %v6332_v31  ;;  %6345 = vtanh.f32 %v4203_v35 }
 0x89f   : > { %v6334_v39 = vpop.eup %6333  ;;  %v5958_v43 = vpop.f32.mrf.mxu0 }
 0x8a0   : > { %4276 = vst [vmem:[%s7291_s30 + $0xb0] sm:$0xff] %v6334_v39  ;;  %6347 = vtanh.f32 %v5958_v43 }
 0x8a1   : > { %v6336_v59 = vpop.eup %6335  ;;  %v4213_v61 = vpop.f32.mrf.mxu0 }
 0x8a2   : > { %4279 = vst [vmem:[%s7291_s30 + $0xc8] sm:$0xff] %v6336_v59  ;;  %6349 = vtanh.f32 %v4213_v61 }
 0x8a3   : > { %v6338_v63 = vpop.eup %6337 }
 0x8a4   : > { %4278 = vst [vmem:[%s7291_s30 + $0xc0] sm:$0xff] %v6338_v63 }
 0x8a5   : > { %v6340_v1 = vpop.eup %6339 }
 0x8a6   : > { %4281 = vst [vmem:[%s7291_s30 + $0xd8] sm:$0xff] %v6340_v1 }
 0x8a7   : > { %v6342_v3 = vpop.eup %6341 }
 0x8a8   : > { %4280 = vst [vmem:[%s7291_s30 + $0xd0] sm:$0xff] %v6342_v3 }
 0x8a9   : > { %v6344_v5 = vpop.eup %6343 }
 0x8aa   : > { %4283 = vst [vmem:[%s7291_s30 + $0xe8] sm:$0xff] %v6344_v5 }
 0x8ab   : > { %v6346_v7 = vpop.eup %6345 }
 0x8ac   : > { %4282 = vst [vmem:[%s7291_s30 + $0xe0] sm:$0xff] %v6346_v7 }
 0x8ad   : > { %v6348_v11 = vpop.eup %6347 }
 0x8ae   : > { %4285 = vst [vmem:[%s7291_s30 + $0xf8] sm:$0xff] %v6348_v11 }
 0x8af   : > { %v6350_v15 = vpop.eup %6349 }
 0x8b0   : > { %4284 = vst [vmem:[%s7291_s30 + $0xf0] sm:$0xff] %v6350_v15 }
 0x8b1 PF: > { %s18_s27 = sadd.s32 1, %s6389_s27  }
 0x8b2   : > { %p15_p4 = scmp.ge.s32.totalorder %s18_s27, 4  }
 0x8b4   :  { %17 = sbr.rel (!%p15_p4) target bundleno = 1 (0x1), region = 87 }

</bundles_post_ra>
